<compile_context>
chip_gen: v5e
topology: v5e:2x2
jax: 0.10.0
libtpu: 0.0.40
codegen_flags: <defaults>
</compile_context>

<pallas_src>
import jax
import jax.numpy as jnp
from jax.experimental import pallas as pl
from jax.experimental.pallas import tpu as pltpu

# ----------------------------- tiny BERT config -----------------------------
BATCH = 2
SEQ = 8
HIDDEN = 32
HEADS = 2
HEAD_DIM = HIDDEN // HEADS
INTERMEDIATE = 64
LAYERS = 2
VOCAB = 50
MAX_POS = 16
TYPE_VOCAB = 2
LN_EPS = 1e-12  # HF BertModel default
ROWS = BATCH * SEQ


# ------------------------------ kernel helpers ------------------------------
def _layer_norm(x, g, b):
    mean = jnp.mean(x, axis=-1, keepdims=True)
    var = jnp.mean((x - mean) ** 2, axis=-1, keepdims=True)
    return (x - mean) * jax.lax.rsqrt(var + LN_EPS) * g + b


def _gelu(x):
    # TODO(synk): exact erf-GELU (HF default); using the tanh approximation.
    c = 0.7978845608028654  # sqrt(2/pi)
    return 0.5 * x * (1.0 + jnp.tanh(c * (x + 0.044715 * x * x * x)))


# ------------------------------- fused kernel -------------------------------
def _bert_kernel(emb_ref, bias_ref, eg_ref, eb_ref,
                 wqkv_ref, bqkv_ref, wo_ref, bo_ref, g1_ref, b1_ref,
                 wi_ref, bi_ref, wd_ref, bd_ref, g2_ref, b2_ref,
                 pw_ref, pb_ref, out_ref):
    f32 = jnp.float32
    bf16 = jnp.bfloat16
    scale = 1.0 / (HEAD_DIM ** 0.5)

    # Embedding LayerNorm on all B*S rows at once.
    h = _layer_norm(emb_ref[...], eg_ref[...], eb_ref[...])          # (BS, H) f32

    # Precomputed block-diagonal (batch isolation) + key-mask additive bias.
    bias = bias_ref[...]                                             # (BS, BS) f32

    for l in range(LAYERS):                                          # unrolled
        # ---- fused QKV projection: one (BS, H) @ (H, 3H) matmul ----
        qkv = (jnp.dot(h.astype(bf16), wqkv_ref[l],
                       preferred_element_type=f32)
               + bqkv_ref[l]).astype(bf16)                           # (BS, 3H) bf16

        # ---- multi-head attention (static per-head unroll, whole batch) ----
        ctx_heads = []
        for hd in range(HEADS):
            q = qkv[:, hd * HEAD_DIM:(hd + 1) * HEAD_DIM]
            k = qkv[:, HIDDEN + hd * HEAD_DIM:HIDDEN + (hd + 1) * HEAD_DIM]
            v = qkv[:, 2 * HIDDEN + hd * HEAD_DIM:2 * HIDDEN + (hd + 1) * HEAD_DIM]

            # scores = q @ k^T  (contract the head dim of both operands)
            scores = jax.lax.dot_general(
                q, k, (((1,), (1,)), ((), ())),
                preferred_element_type=f32) * scale + bias           # (BS, BS)
            scores = scores - jnp.max(scores, axis=-1, keepdims=True)
            p = jnp.exp(scores)
            p = p * pl.reciprocal(jnp.sum(p, axis=-1, keepdims=True), approx=True)

            ctx_heads.append(jnp.dot(p.astype(bf16), v,
                                     preferred_element_type=f32))    # (BS, Dh)

        # Lane-concat heads, then ONE output projection matmul per layer.
        ctx = jnp.concatenate(ctx_heads, axis=-1)                    # (BS, H) f32
        attn_out = jnp.dot(ctx.astype(bf16), wo_ref[l],
                           preferred_element_type=f32) + bo_ref[l]

        # ---- add & LayerNorm 1 ----
        h = _layer_norm(attn_out + h, g1_ref[l], b1_ref[l])

        # ---- feed-forward (f32 GELU, bf16 MXU operands) ----
        inter = jnp.dot(h.astype(bf16), wi_ref[l],
                        preferred_element_type=f32) + bi_ref[l]      # (BS, I)
        inter = _gelu(inter)
        ffn = jnp.dot(inter.astype(bf16), wd_ref[l],
                      preferred_element_type=f32) + bd_ref[l]        # (BS, H)

        # ---- add & LayerNorm 2 ----
        h = _layer_norm(ffn + h, g2_ref[l], b2_ref[l])

    # ---- pooler on ALL [CLS] rows (rows 0, S, 2S, ...) in one matmul ----
    cls = jnp.concatenate([h[b * SEQ:b * SEQ + 1, :] for b in range(BATCH)],
                          axis=0)                                    # (B, H) f32
    pooled = jnp.tanh(jnp.dot(cls.astype(bf16), pw_ref[...],
                              preferred_element_type=f32) + pb_ref[...])
    out_ref[...] = pooled


# --------------------------- parameter preparation ---------------------------
def _prep_params(params):
    """Stack per-layer weights, merge QKV, cast matmul weights to bf16."""
    L = LAYERS
    lyr = params["layers"]
    wqkv = jnp.stack(
        [jnp.concatenate([lp["wq"], lp["wk"], lp["wv"]], axis=1) for lp in lyr]
    ).astype(jnp.bfloat16)                                           # (L, H, 3H)
    bqkv = jnp.stack(
        [jnp.concatenate([lp["bq"], lp["bk"], lp["bv"]]) for lp in lyr]
    ).reshape(L, 1, 3 * HIDDEN)
    stk = lambda name: jnp.stack([lp[name] for lp in lyr])
    return dict(
        eg=params["emb_ln_g"].reshape(1, HIDDEN),
        eb=params["emb_ln_b"].reshape(1, HIDDEN),
        wqkv=wqkv, bqkv=bqkv,
        wo=stk("wo").astype(jnp.bfloat16), bo=stk("bo").reshape(L, 1, HIDDEN),
        g1=stk("ln1_g").reshape(L, 1, HIDDEN), b1=stk("ln1_b").reshape(L, 1, HIDDEN),
        wi=stk("wi").astype(jnp.bfloat16), bi=stk("bi").reshape(L, 1, INTERMEDIATE),
        wd=stk("wd").astype(jnp.bfloat16), bd=stk("bd").reshape(L, 1, HIDDEN),
        g2=stk("ln2_g").reshape(L, 1, HIDDEN), b2=stk("ln2_b").reshape(L, 1, HIDDEN),
        pw=params["pool_w"].astype(jnp.bfloat16),
        pb=params["pool_b"].reshape(1, HIDDEN),
    )


# -------------------------------- forward pass -------------------------------
def bert_pooled(params, input_ids, attention_mask):
    B, S = input_ids.shape
    assert (B, S) == (BATCH, SEQ)

    # Embedding gathers are glue -> plain JAX.
    tok = params["word_emb"][input_ids]                              # (B, S, H)
    pos = params["pos_emb"][jnp.arange(S)][None, :, :]               # (1, S, H)
    typ = params["type_emb"][jnp.zeros_like(input_ids)]              # (B, S, H)
    # TODO(synk): token_type_ids hard-coded to zeros (matches reference call).
    emb = (tok + pos + typ).reshape(B * S, HIDDEN).astype(jnp.float32)

    # Block-diagonal additive attention bias (batch isolation + key mask),
    # built once in the wrapper and reused by every head/layer score add.
    rows = jnp.arange(B * S)
    same_batch = (rows[:, None] // S) == (rows[None, :] // S)        # (BS, BS)
    key_valid = attention_mask.reshape(B * S) > 0                    # (BS,)
    bias = jnp.where(same_batch & key_valid[None, :], 0.0, -1e9
                     ).astype(jnp.float32)                           # (BS, BS)

    p = _prep_params(params)
    L = LAYERS
    full2 = lambda i: (0, 0)
    full3 = lambda i: (0, 0, 0)

    in_specs = [
        pl.BlockSpec((B * S, HIDDEN), full2),                        # emb
        pl.BlockSpec((B * S, B * S), full2),                         # attn bias
        pl.BlockSpec((1, HIDDEN), full2),                            # emb LN gamma
        pl.BlockSpec((1, HIDDEN), full2),                            # emb LN beta
        pl.BlockSpec((L, HIDDEN, 3 * HIDDEN), full3),                # wqkv
        pl.BlockSpec((L, 1, 3 * HIDDEN), full3),                     # bqkv
        pl.BlockSpec((L, HIDDEN, HIDDEN), full3),                    # wo
        pl.BlockSpec((L, 1, HIDDEN), full3),                         # bo
        pl.BlockSpec((L, 1, HIDDEN), full3),                         # ln1 gamma
        pl.BlockSpec((L, 1, HIDDEN), full3),                         # ln1 beta
        pl.BlockSpec((L, HIDDEN, INTERMEDIATE), full3),              # wi
        pl.BlockSpec((L, 1, INTERMEDIATE), full3),                   # bi
        pl.BlockSpec((L, INTERMEDIATE, HIDDEN), full3),              # wd
        pl.BlockSpec((L, 1, HIDDEN), full3),                         # bd
        pl.BlockSpec((L, 1, HIDDEN), full3),                         # ln2 gamma
        pl.BlockSpec((L, 1, HIDDEN), full3),                         # ln2 beta
        pl.BlockSpec((HIDDEN, HIDDEN), full2),                       # pool_w
        pl.BlockSpec((1, HIDDEN), full2),                            # pool_b
    ]

    pooled = pl.pallas_call(
        _bert_kernel,
        out_shape=jax.ShapeDtypeStruct((B, HIDDEN), jnp.float32),
        grid=(1,),                                                   # batch folded in
        in_specs=in_specs,
        out_specs=pl.BlockSpec((B, HIDDEN), full2),
        compiler_params=pltpu.CompilerParams(
            dimension_semantics=("arbitrary",)),
    )(emb, bias, p["eg"], p["eb"], p["wqkv"], p["bqkv"], p["wo"], p["bo"],
      p["g1"], p["b1"], p["wi"], p["bi"], p["wd"], p["bd"], p["g2"], p["b2"],
      p["pw"], p["pb"])
    return pooled


# --------------------------- deterministic weights ---------------------------
def init_params(key):
    keys = iter(jax.random.split(key, 64))

    def w(shape, scale=0.02):
        return (scale * jax.random.normal(next(keys), shape)).astype(jnp.float32)

    def zeros(shape):
        return jnp.zeros(shape, jnp.float32)

    def ones(shape):
        return jnp.ones(shape, jnp.float32)

    params = {
        "word_emb": w((VOCAB, HIDDEN)),
        "pos_emb": w((MAX_POS, HIDDEN)),
        "type_emb": w((TYPE_VOCAB, HIDDEN)),
        "emb_ln_g": ones((HIDDEN,)),
        "emb_ln_b": zeros((HIDDEN,)),
        "layers": [],
        "pool_w": w((HIDDEN, HIDDEN)),
        "pool_b": zeros((HIDDEN,)),
    }
    for _ in range(LAYERS):
        params["layers"].append(
            dict(
                wq=w((HIDDEN, HIDDEN)), bq=zeros((HIDDEN,)),
                wk=w((HIDDEN, HIDDEN)), bk=zeros((HIDDEN,)),
                wv=w((HIDDEN, HIDDEN)), bv=zeros((HIDDEN,)),
                wo=w((HIDDEN, HIDDEN)), bo=zeros((HIDDEN,)),
                ln1_g=ones((HIDDEN,)), ln1_b=zeros((HIDDEN,)),
                wi=w((HIDDEN, INTERMEDIATE)), bi=zeros((INTERMEDIATE,)),
                wd=w((INTERMEDIATE, HIDDEN)), bd=zeros((HIDDEN,)),
                ln2_g=ones((HIDDEN,)), ln2_b=zeros((HIDDEN,)),
            )
        )
    return params


# ------------------------------------ main -----------------------------------
if __name__ == "__main__":
    key = jax.random.PRNGKey(0)
    pkey, ikey = jax.random.split(key)
    params = init_params(pkey)

    input_ids = jax.random.randint(ikey, (BATCH, SEQ), 0, VOCAB, dtype=jnp.int32)
    attention_mask = jnp.array(
        [[1] * SEQ, [1] * (SEQ - 2) + [0, 0]], dtype=jnp.int32
    )  # second example has 2 padding tokens

    fwd = jax.jit(bert_pooled)
    pooled = fwd(params, input_ids, attention_mask)
    jax.block_until_ready(pooled)
    assert pooled.shape == (BATCH, HIDDEN) and pooled.dtype == jnp.float32
    print("KERNEL_OK")
</pallas_src>

<mosaic_0001>
module attributes {stable_mosaic.version = 11 : i64} {
  func.func @_bert_kernel(%arg0: i32, %arg1: memref<16x32xf32, #tpu.memory_space<vmem>>, %arg2: memref<16x16xf32, #tpu.memory_space<vmem>>, %arg3: memref<1x32xf32, #tpu.memory_space<vmem>>, %arg4: memref<1x32xf32, #tpu.memory_space<vmem>>, %arg5: memref<2x32x96xbf16, #tpu.memory_space<vmem>>, %arg6: memref<2x1x96xf32, #tpu.memory_space<vmem>>, %arg7: memref<2x32x32xbf16, #tpu.memory_space<vmem>>, %arg8: memref<2x1x32xf32, #tpu.memory_space<vmem>>, %arg9: memref<2x1x32xf32, #tpu.memory_space<vmem>>, %arg10: memref<2x1x32xf32, #tpu.memory_space<vmem>>, %arg11: memref<2x32x64xbf16, #tpu.memory_space<vmem>>, %arg12: memref<2x1x64xf32, #tpu.memory_space<vmem>>, %arg13: memref<2x64x32xbf16, #tpu.memory_space<vmem>>, %arg14: memref<2x1x32xf32, #tpu.memory_space<vmem>>, %arg15: memref<2x1x32xf32, #tpu.memory_space<vmem>>, %arg16: memref<2x1x32xf32, #tpu.memory_space<vmem>>, %arg17: memref<32x32xbf16, #tpu.memory_space<vmem>>, %arg18: memref<1x32xf32, #tpu.memory_space<vmem>>, %arg19: memref<2x32xf32, #tpu.memory_space<vmem>>) attributes {dimension_semantics = [#tpu.dimension_semantics<arbitrary>], iteration_bounds = array<i64: 1>, scalar_prefetch = 0 : i64, scratch_operands = 0 : i64, tpu.core_type = #tpu.core_type<tc>, window_params = [{pipeline_mode = #tpu.pipeline_mode<synchronous>, transform_indices = @transform_0, window_bounds = array<i64: 16, 32>}, {pipeline_mode = #tpu.pipeline_mode<synchronous>, transform_indices = @transform_1, window_bounds = array<i64: 16, 16>}, {pipeline_mode = #tpu.pipeline_mode<synchronous>, transform_indices = @transform_2, window_bounds = array<i64: 1, 32>}, {pipeline_mode = #tpu.pipeline_mode<synchronous>, transform_indices = @transform_3, window_bounds = array<i64: 1, 32>}, {pipeline_mode = #tpu.pipeline_mode<synchronous>, transform_indices = @transform_4, window_bounds = array<i64: 2, 32, 96>}, {pipeline_mode = #tpu.pipeline_mode<synchronous>, transform_indices = @transform_5, window_bounds = array<i64: 2, 1, 96>}, {pipeline_mode = #tpu.pipeline_mode<synchronous>, transform_indices = @transform_6, window_bounds = array<i64: 2, 32, 32>}, {pipeline_mode = #tpu.pipeline_mode<synchronous>, transform_indices = @transform_7, window_bounds = array<i64: 2, 1, 32>}, {pipeline_mode = #tpu.pipeline_mode<synchronous>, transform_indices = @transform_8, window_bounds = array<i64: 2, 1, 32>}, {pipeline_mode = #tpu.pipeline_mode<synchronous>, transform_indices = @transform_9, window_bounds = array<i64: 2, 1, 32>}, {pipeline_mode = #tpu.pipeline_mode<synchronous>, transform_indices = @transform_10, window_bounds = array<i64: 2, 32, 64>}, {pipeline_mode = #tpu.pipeline_mode<synchronous>, transform_indices = @transform_11, window_bounds = array<i64: 2, 1, 64>}, {pipeline_mode = #tpu.pipeline_mode<synchronous>, transform_indices = @transform_12, window_bounds = array<i64: 2, 64, 32>}, {pipeline_mode = #tpu.pipeline_mode<synchronous>, transform_indices = @transform_13, window_bounds = array<i64: 2, 1, 32>}, {pipeline_mode = #tpu.pipeline_mode<synchronous>, transform_indices = @transform_14, window_bounds = array<i64: 2, 1, 32>}, {pipeline_mode = #tpu.pipeline_mode<synchronous>, transform_indices = @transform_15, window_bounds = array<i64: 2, 1, 32>}, {pipeline_mode = #tpu.pipeline_mode<synchronous>, transform_indices = @transform_16, window_bounds = array<i64: 32, 32>}, {pipeline_mode = #tpu.pipeline_mode<synchronous>, transform_indices = @transform_17, window_bounds = array<i64: 1, 32>}, {pipeline_mode = #tpu.pipeline_mode<synchronous>, transform_indices = @transform_18, window_bounds = array<i64: 2, 32>}]} {
    %c0 = arith.constant 0 : index
    %c0_0 = arith.constant 0 : index
    %0 = vector.load %arg1[%c0, %c0_0] : memref<16x32xf32, #tpu.memory_space<vmem>>, vector<16x32xf32>
    %c0_1 = arith.constant 0 : index
    %c0_2 = arith.constant 0 : index
    %1 = vector.load %arg3[%c0_1, %c0_2] : memref<1x32xf32, #tpu.memory_space<vmem>>, vector<1x32xf32>
    %c0_3 = arith.constant 0 : index
    %c0_4 = arith.constant 0 : index
    %2 = vector.load %arg4[%c0_3, %c0_4] : memref<1x32xf32, #tpu.memory_space<vmem>>, vector<1x32xf32>
    %cst = arith.constant dense<0.000000e+00> : vector<16xf32>
    %3 = vector.multi_reduction <add>, %0, %cst [1] : vector<16x32xf32> to vector<16xf32>
    %4 = vector.shape_cast %3 : vector<16xf32> to vector<16x1xf32>
    %cst_5 = arith.constant 3.200000e+01 : f32
    %5 = vector.broadcast %cst_5 : f32 to vector<16x1xf32>
    %6 = arith.divf %4, %5 : vector<16x1xf32>
    %7 = vector.broadcast %6 : vector<16x1xf32> to vector<16x32xf32>
    %8 = arith.subf %0, %7 : vector<16x32xf32>
    %9 = arith.mulf %8, %8 : vector<16x32xf32>
    %cst_6 = arith.constant dense<0.000000e+00> : vector<16xf32>
    %10 = vector.multi_reduction <add>, %9, %cst_6 [1] : vector<16x32xf32> to vector<16xf32>
    %11 = vector.shape_cast %10 : vector<16xf32> to vector<16x1xf32>
    %cst_7 = arith.constant 3.200000e+01 : f32
    %12 = vector.broadcast %cst_7 : f32 to vector<16x1xf32>
    %13 = arith.divf %11, %12 : vector<16x1xf32>
    %14 = vector.broadcast %6 : vector<16x1xf32> to vector<16x32xf32>
    %15 = arith.subf %0, %14 : vector<16x32xf32>
    %cst_8 = arith.constant 9.99999996E-13 : f32
    %16 = vector.broadcast %cst_8 : f32 to vector<16x1xf32>
    %17 = arith.addf %13, %16 : vector<16x1xf32>
    %18 = math.rsqrt %17 : vector<16x1xf32>
    %19 = vector.broadcast %18 : vector<16x1xf32> to vector<16x32xf32>
    %20 = arith.mulf %15, %19 : vector<16x32xf32>
    %21 = vector.broadcast %1 : vector<1x32xf32> to vector<16x32xf32>
    %22 = arith.mulf %20, %21 : vector<16x32xf32>
    %23 = vector.broadcast %2 : vector<1x32xf32> to vector<16x32xf32>
    %24 = arith.addf %22, %23 : vector<16x32xf32>
    %c0_9 = arith.constant 0 : index
    %c0_10 = arith.constant 0 : index
    %25 = vector.load %arg2[%c0_9, %c0_10] : memref<16x16xf32, #tpu.memory_space<vmem>>, vector<16x16xf32>
    %26 = arith.truncf %24 : vector<16x32xf32> to vector<16x32xbf16>
    %c0_11 = arith.constant 0 : index
    %c0_12 = arith.constant 0 : index
    %c0_13 = arith.constant 0 : index
    %27 = vector.load %arg5[%c0_11, %c0_12, %c0_13] : memref<2x32x96xbf16, #tpu.memory_space<vmem>>, vector<1x32x96xbf16>
    %28 = vector.shape_cast %27 : vector<1x32x96xbf16> to vector<32x96xbf16>
    %cst_14 = arith.constant dense<0.000000e+00> : vector<16x96xf32>
    %29 = tpu.matmul %26, %28, %cst_14 {dimension_numbers = #tpu.dot_dimension_numbers<[1], [0], [0], [1], [0, 0, 1, 1], [], []>} : vector<16x32xbf16>, vector<32x96xbf16>, vector<16x96xf32> -> vector<16x96xf32>
    %c0_15 = arith.constant 0 : index
    %c0_16 = arith.constant 0 : index
    %c0_17 = arith.constant 0 : index
    %30 = vector.load %arg6[%c0_15, %c0_16, %c0_17] : memref<2x1x96xf32, #tpu.memory_space<vmem>>, vector<1x1x96xf32>
    %31 = vector.shape_cast %30 : vector<1x1x96xf32> to vector<1x96xf32>
    %32 = vector.broadcast %31 : vector<1x96xf32> to vector<16x96xf32>
    %33 = arith.addf %29, %32 : vector<16x96xf32>
    %34 = arith.truncf %33 : vector<16x96xf32> to vector<16x96xbf16>
    %35 = vector.extract_strided_slice %34 {offsets = [0, 0], sizes = [16, 16], strides = [1, 1]} : vector<16x96xbf16> to vector<16x16xbf16>
    %36 = vector.extract_strided_slice %34 {offsets = [0, 32], sizes = [16, 16], strides = [1, 1]} : vector<16x96xbf16> to vector<16x16xbf16>
    %37 = vector.extract_strided_slice %34 {offsets = [0, 64], sizes = [16, 16], strides = [1, 1]} : vector<16x96xbf16> to vector<16x16xbf16>
    %cst_18 = arith.constant dense<0.000000e+00> : vector<16x16xf32>
    %38 = tpu.matmul %35, %36, %cst_18 {dimension_numbers = #tpu.dot_dimension_numbers<[1], [1], [0], [0], [0, 0, 1, 0], [], []>} : vector<16x16xbf16>, vector<16x16xbf16>, vector<16x16xf32> -> vector<16x16xf32>
    %cst_19 = arith.constant 2.500000e-01 : f32
    %39 = vector.broadcast %cst_19 : f32 to vector<16x16xf32>
    %40 = arith.mulf %38, %39 : vector<16x16xf32>
    %41 = arith.addf %40, %25 : vector<16x16xf32>
    %cst_20 = arith.constant dense<0xFF800000> : vector<16xf32>
    %42 = vector.multi_reduction <maximumf>, %41, %cst_20 [1] : vector<16x16xf32> to vector<16xf32>
    %43 = vector.shape_cast %42 : vector<16xf32> to vector<16x1xf32>
    %44 = vector.broadcast %43 : vector<16x1xf32> to vector<16x16xf32>
    %45 = arith.subf %41, %44 : vector<16x16xf32>
    %46 = math.exp %45 : vector<16x16xf32>
    %cst_21 = arith.constant dense<0.000000e+00> : vector<16xf32>
    %47 = vector.multi_reduction <add>, %46, %cst_21 [1] : vector<16x16xf32> to vector<16xf32>
    %48 = vector.shape_cast %47 : vector<16xf32> to vector<16x1xf32>
    %49 = tpu.reciprocal %48 {approx = true} : vector<16x1xf32> -> vector<16x1xf32>
    %50 = vector.broadcast %49 : vector<16x1xf32> to vector<16x16xf32>
    %51 = arith.mulf %46, %50 : vector<16x16xf32>
    %52 = arith.truncf %51 : vector<16x16xf32> to vector<16x16xbf16>
    %cst_22 = arith.constant dense<0.000000e+00> : vector<16x16xf32>
    %53 = tpu.matmul %52, %37, %cst_22 {dimension_numbers = #tpu.dot_dimension_numbers<[1], [0], [0], [1], [0, 0, 1, 1], [], []>} : vector<16x16xbf16>, vector<16x16xbf16>, vector<16x16xf32> -> vector<16x16xf32>
    %54 = vector.extract_strided_slice %34 {offsets = [0, 16], sizes = [16, 16], strides = [1, 1]} : vector<16x96xbf16> to vector<16x16xbf16>
    %55 = vector.extract_strided_slice %34 {offsets = [0, 48], sizes = [16, 16], strides = [1, 1]} : vector<16x96xbf16> to vector<16x16xbf16>
    %56 = vector.extract_strided_slice %34 {offsets = [0, 80], sizes = [16, 16], strides = [1, 1]} : vector<16x96xbf16> to vector<16x16xbf16>
    %cst_23 = arith.constant dense<0.000000e+00> : vector<16x16xf32>
    %57 = tpu.matmul %54, %55, %cst_23 {dimension_numbers = #tpu.dot_dimension_numbers<[1], [1], [0], [0], [0, 0, 1, 0], [], []>} : vector<16x16xbf16>, vector<16x16xbf16>, vector<16x16xf32> -> vector<16x16xf32>
    %cst_24 = arith.constant 2.500000e-01 : f32
    %58 = vector.broadcast %cst_24 : f32 to vector<16x16xf32>
    %59 = arith.mulf %57, %58 : vector<16x16xf32>
    %60 = arith.addf %59, %25 : vector<16x16xf32>
    %cst_25 = arith.constant dense<0xFF800000> : vector<16xf32>
    %61 = vector.multi_reduction <maximumf>, %60, %cst_25 [1] : vector<16x16xf32> to vector<16xf32>
    %62 = vector.shape_cast %61 : vector<16xf32> to vector<16x1xf32>
    %63 = vector.broadcast %62 : vector<16x1xf32> to vector<16x16xf32>
    %64 = arith.subf %60, %63 : vector<16x16xf32>
    %65 = math.exp %64 : vector<16x16xf32>
    %cst_26 = arith.constant dense<0.000000e+00> : vector<16xf32>
    %66 = vector.multi_reduction <add>, %65, %cst_26 [1] : vector<16x16xf32> to vector<16xf32>
    %67 = vector.shape_cast %66 : vector<16xf32> to vector<16x1xf32>
    %68 = tpu.reciprocal %67 {approx = true} : vector<16x1xf32> -> vector<16x1xf32>
    %69 = vector.broadcast %68 : vector<16x1xf32> to vector<16x16xf32>
    %70 = arith.mulf %65, %69 : vector<16x16xf32>
    %71 = arith.truncf %70 : vector<16x16xf32> to vector<16x16xbf16>
    %cst_27 = arith.constant dense<0.000000e+00> : vector<16x16xf32>
    %72 = tpu.matmul %71, %56, %cst_27 {dimension_numbers = #tpu.dot_dimension_numbers<[1], [0], [0], [1], [0, 0, 1, 1], [], []>} : vector<16x16xbf16>, vector<16x16xbf16>, vector<16x16xf32> -> vector<16x16xf32>
    %73 = tpu.concatenate %53, %72 in 1 : vector<16x16xf32>, vector<16x16xf32> -> vector<16x32xf32>
    %74 = arith.truncf %73 : vector<16x32xf32> to vector<16x32xbf16>
    %c0_28 = arith.constant 0 : index
    %c0_29 = arith.constant 0 : index
    %c0_30 = arith.constant 0 : index
    %75 = vector.load %arg7[%c0_28, %c0_29, %c0_30] : memref<2x32x32xbf16, #tpu.memory_space<vmem>>, vector<1x32x32xbf16>
    %76 = vector.shape_cast %75 : vector<1x32x32xbf16> to vector<32x32xbf16>
    %cst_31 = arith.constant dense<0.000000e+00> : vector<16x32xf32>
    %77 = tpu.matmul %74, %76, %cst_31 {dimension_numbers = #tpu.dot_dimension_numbers<[1], [0], [0], [1], [0, 0, 1, 1], [], []>} : vector<16x32xbf16>, vector<32x32xbf16>, vector<16x32xf32> -> vector<16x32xf32>
    %c0_32 = arith.constant 0 : index
    %c0_33 = arith.constant 0 : index
    %c0_34 = arith.constant 0 : index
    %78 = vector.load %arg8[%c0_32, %c0_33, %c0_34] : memref<2x1x32xf32, #tpu.memory_space<vmem>>, vector<1x1x32xf32>
    %79 = vector.shape_cast %78 : vector<1x1x32xf32> to vector<1x32xf32>
    %80 = vector.broadcast %79 : vector<1x32xf32> to vector<16x32xf32>
    %81 = arith.addf %77, %80 : vector<16x32xf32>
    %82 = arith.addf %81, %24 : vector<16x32xf32>
    %c0_35 = arith.constant 0 : index
    %c0_36 = arith.constant 0 : index
    %c0_37 = arith.constant 0 : index
    %83 = vector.load %arg9[%c0_35, %c0_36, %c0_37] : memref<2x1x32xf32, #tpu.memory_space<vmem>>, vector<1x1x32xf32>
    %84 = vector.shape_cast %83 : vector<1x1x32xf32> to vector<1x32xf32>
    %c0_38 = arith.constant 0 : index
    %c0_39 = arith.constant 0 : index
    %c0_40 = arith.constant 0 : index
    %85 = vector.load %arg10[%c0_38, %c0_39, %c0_40] : memref<2x1x32xf32, #tpu.memory_space<vmem>>, vector<1x1x32xf32>
    %86 = vector.shape_cast %85 : vector<1x1x32xf32> to vector<1x32xf32>
    %cst_41 = arith.constant dense<0.000000e+00> : vector<16xf32>
    %87 = vector.multi_reduction <add>, %82, %cst_41 [1] : vector<16x32xf32> to vector<16xf32>
    %88 = vector.shape_cast %87 : vector<16xf32> to vector<16x1xf32>
    %cst_42 = arith.constant 3.200000e+01 : f32
    %89 = vector.broadcast %cst_42 : f32 to vector<16x1xf32>
    %90 = arith.divf %88, %89 : vector<16x1xf32>
    %91 = vector.broadcast %90 : vector<16x1xf32> to vector<16x32xf32>
    %92 = arith.subf %82, %91 : vector<16x32xf32>
    %93 = arith.mulf %92, %92 : vector<16x32xf32>
    %cst_43 = arith.constant dense<0.000000e+00> : vector<16xf32>
    %94 = vector.multi_reduction <add>, %93, %cst_43 [1] : vector<16x32xf32> to vector<16xf32>
    %95 = vector.shape_cast %94 : vector<16xf32> to vector<16x1xf32>
    %cst_44 = arith.constant 3.200000e+01 : f32
    %96 = vector.broadcast %cst_44 : f32 to vector<16x1xf32>
    %97 = arith.divf %95, %96 : vector<16x1xf32>
    %98 = vector.broadcast %90 : vector<16x1xf32> to vector<16x32xf32>
    %99 = arith.subf %82, %98 : vector<16x32xf32>
    %cst_45 = arith.constant 9.99999996E-13 : f32
    %100 = vector.broadcast %cst_45 : f32 to vector<16x1xf32>
    %101 = arith.addf %97, %100 : vector<16x1xf32>
    %102 = math.rsqrt %101 : vector<16x1xf32>
    %103 = vector.broadcast %102 : vector<16x1xf32> to vector<16x32xf32>
    %104 = arith.mulf %99, %103 : vector<16x32xf32>
    %105 = vector.broadcast %84 : vector<1x32xf32> to vector<16x32xf32>
    %106 = arith.mulf %104, %105 : vector<16x32xf32>
    %107 = vector.broadcast %86 : vector<1x32xf32> to vector<16x32xf32>
    %108 = arith.addf %106, %107 : vector<16x32xf32>
    %109 = arith.truncf %108 : vector<16x32xf32> to vector<16x32xbf16>
    %c0_46 = arith.constant 0 : index
    %c0_47 = arith.constant 0 : index
    %c0_48 = arith.constant 0 : index
    %110 = vector.load %arg11[%c0_46, %c0_47, %c0_48] : memref<2x32x64xbf16, #tpu.memory_space<vmem>>, vector<1x32x64xbf16>
    %111 = vector.shape_cast %110 : vector<1x32x64xbf16> to vector<32x64xbf16>
    %cst_49 = arith.constant dense<0.000000e+00> : vector<16x64xf32>
    %112 = tpu.matmul %109, %111, %cst_49 {dimension_numbers = #tpu.dot_dimension_numbers<[1], [0], [0], [1], [0, 0, 1, 1], [], []>} : vector<16x32xbf16>, vector<32x64xbf16>, vector<16x64xf32> -> vector<16x64xf32>
    %c0_50 = arith.constant 0 : index
    %c0_51 = arith.constant 0 : index
    %c0_52 = arith.constant 0 : index
    %113 = vector.load %arg12[%c0_50, %c0_51, %c0_52] : memref<2x1x64xf32, #tpu.memory_space<vmem>>, vector<1x1x64xf32>
    %114 = vector.shape_cast %113 : vector<1x1x64xf32> to vector<1x64xf32>
    %115 = vector.broadcast %114 : vector<1x64xf32> to vector<16x64xf32>
    %116 = arith.addf %112, %115 : vector<16x64xf32>
    %cst_53 = arith.constant 5.000000e-01 : f32
    %117 = vector.broadcast %cst_53 : f32 to vector<16x64xf32>
    %118 = arith.mulf %117, %116 : vector<16x64xf32>
    %cst_54 = arith.constant 4.471500e-02 : f32
    %119 = vector.broadcast %cst_54 : f32 to vector<16x64xf32>
    %120 = arith.mulf %119, %116 : vector<16x64xf32>
    %121 = arith.mulf %120, %116 : vector<16x64xf32>
    %122 = arith.mulf %121, %116 : vector<16x64xf32>
    %123 = arith.addf %116, %122 : vector<16x64xf32>
    %cst_55 = arith.constant 0.797884583 : f32
    %124 = vector.broadcast %cst_55 : f32 to vector<16x64xf32>
    %125 = arith.mulf %124, %123 : vector<16x64xf32>
    %126 = math.tanh %125 : vector<16x64xf32>
    %cst_56 = arith.constant 1.000000e+00 : f32
    %127 = vector.broadcast %cst_56 : f32 to vector<16x64xf32>
    %128 = arith.addf %127, %126 : vector<16x64xf32>
    %129 = arith.mulf %118, %128 : vector<16x64xf32>
    %130 = arith.truncf %129 : vector<16x64xf32> to vector<16x64xbf16>
    %c0_57 = arith.constant 0 : index
    %c0_58 = arith.constant 0 : index
    %c0_59 = arith.constant 0 : index
    %131 = vector.load %arg13[%c0_57, %c0_58, %c0_59] : memref<2x64x32xbf16, #tpu.memory_space<vmem>>, vector<1x64x32xbf16>
    %132 = vector.shape_cast %131 : vector<1x64x32xbf16> to vector<64x32xbf16>
    %cst_60 = arith.constant dense<0.000000e+00> : vector<16x32xf32>
    %133 = tpu.matmul %130, %132, %cst_60 {dimension_numbers = #tpu.dot_dimension_numbers<[1], [0], [0], [1], [0, 0, 1, 1], [], []>} : vector<16x64xbf16>, vector<64x32xbf16>, vector<16x32xf32> -> vector<16x32xf32>
    %c0_61 = arith.constant 0 : index
    %c0_62 = arith.constant 0 : index
    %c0_63 = arith.constant 0 : index
    %134 = vector.load %arg14[%c0_61, %c0_62, %c0_63] : memref<2x1x32xf32, #tpu.memory_space<vmem>>, vector<1x1x32xf32>
    %135 = vector.shape_cast %134 : vector<1x1x32xf32> to vector<1x32xf32>
    %136 = vector.broadcast %135 : vector<1x32xf32> to vector<16x32xf32>
    %137 = arith.addf %133, %136 : vector<16x32xf32>
    %138 = arith.addf %137, %108 : vector<16x32xf32>
    %c0_64 = arith.constant 0 : index
    %c0_65 = arith.constant 0 : index
    %c0_66 = arith.constant 0 : index
    %139 = vector.load %arg15[%c0_64, %c0_65, %c0_66] : memref<2x1x32xf32, #tpu.memory_space<vmem>>, vector<1x1x32xf32>
    %140 = vector.shape_cast %139 : vector<1x1x32xf32> to vector<1x32xf32>
    %c0_67 = arith.constant 0 : index
    %c0_68 = arith.constant 0 : index
    %c0_69 = arith.constant 0 : index
    %141 = vector.load %arg16[%c0_67, %c0_68, %c0_69] : memref<2x1x32xf32, #tpu.memory_space<vmem>>, vector<1x1x32xf32>
    %142 = vector.shape_cast %141 : vector<1x1x32xf32> to vector<1x32xf32>
    %cst_70 = arith.constant dense<0.000000e+00> : vector<16xf32>
    %143 = vector.multi_reduction <add>, %138, %cst_70 [1] : vector<16x32xf32> to vector<16xf32>
    %144 = vector.shape_cast %143 : vector<16xf32> to vector<16x1xf32>
    %cst_71 = arith.constant 3.200000e+01 : f32
    %145 = vector.broadcast %cst_71 : f32 to vector<16x1xf32>
    %146 = arith.divf %144, %145 : vector<16x1xf32>
    %147 = vector.broadcast %146 : vector<16x1xf32> to vector<16x32xf32>
    %148 = arith.subf %138, %147 : vector<16x32xf32>
    %149 = arith.mulf %148, %148 : vector<16x32xf32>
    %cst_72 = arith.constant dense<0.000000e+00> : vector<16xf32>
    %150 = vector.multi_reduction <add>, %149, %cst_72 [1] : vector<16x32xf32> to vector<16xf32>
    %151 = vector.shape_cast %150 : vector<16xf32> to vector<16x1xf32>
    %cst_73 = arith.constant 3.200000e+01 : f32
    %152 = vector.broadcast %cst_73 : f32 to vector<16x1xf32>
    %153 = arith.divf %151, %152 : vector<16x1xf32>
    %154 = vector.broadcast %146 : vector<16x1xf32> to vector<16x32xf32>
    %155 = arith.subf %138, %154 : vector<16x32xf32>
    %cst_74 = arith.constant 9.99999996E-13 : f32
    %156 = vector.broadcast %cst_74 : f32 to vector<16x1xf32>
    %157 = arith.addf %153, %156 : vector<16x1xf32>
    %158 = math.rsqrt %157 : vector<16x1xf32>
    %159 = vector.broadcast %158 : vector<16x1xf32> to vector<16x32xf32>
    %160 = arith.mulf %155, %159 : vector<16x32xf32>
    %161 = vector.broadcast %140 : vector<1x32xf32> to vector<16x32xf32>
    %162 = arith.mulf %160, %161 : vector<16x32xf32>
    %163 = vector.broadcast %142 : vector<1x32xf32> to vector<16x32xf32>
    %164 = arith.addf %162, %163 : vector<16x32xf32>
    %165 = arith.truncf %164 : vector<16x32xf32> to vector<16x32xbf16>
    %c1 = arith.constant 1 : index
    %c0_75 = arith.constant 0 : index
    %c0_76 = arith.constant 0 : index
    %166 = vector.load %arg5[%c1, %c0_75, %c0_76] : memref<2x32x96xbf16, #tpu.memory_space<vmem>>, vector<1x32x96xbf16>
    %167 = vector.shape_cast %166 : vector<1x32x96xbf16> to vector<32x96xbf16>
    %cst_77 = arith.constant dense<0.000000e+00> : vector<16x96xf32>
    %168 = tpu.matmul %165, %167, %cst_77 {dimension_numbers = #tpu.dot_dimension_numbers<[1], [0], [0], [1], [0, 0, 1, 1], [], []>} : vector<16x32xbf16>, vector<32x96xbf16>, vector<16x96xf32> -> vector<16x96xf32>
    %c1_78 = arith.constant 1 : index
    %c0_79 = arith.constant 0 : index
    %c0_80 = arith.constant 0 : index
    %169 = vector.load %arg6[%c1_78, %c0_79, %c0_80] : memref<2x1x96xf32, #tpu.memory_space<vmem>>, vector<1x1x96xf32>
    %170 = vector.shape_cast %169 : vector<1x1x96xf32> to vector<1x96xf32>
    %171 = vector.broadcast %170 : vector<1x96xf32> to vector<16x96xf32>
    %172 = arith.addf %168, %171 : vector<16x96xf32>
    %173 = arith.truncf %172 : vector<16x96xf32> to vector<16x96xbf16>
    %174 = vector.extract_strided_slice %173 {offsets = [0, 0], sizes = [16, 16], strides = [1, 1]} : vector<16x96xbf16> to vector<16x16xbf16>
    %175 = vector.extract_strided_slice %173 {offsets = [0, 32], sizes = [16, 16], strides = [1, 1]} : vector<16x96xbf16> to vector<16x16xbf16>
    %176 = vector.extract_strided_slice %173 {offsets = [0, 64], sizes = [16, 16], strides = [1, 1]} : vector<16x96xbf16> to vector<16x16xbf16>
    %cst_81 = arith.constant dense<0.000000e+00> : vector<16x16xf32>
    %177 = tpu.matmul %174, %175, %cst_81 {dimension_numbers = #tpu.dot_dimension_numbers<[1], [1], [0], [0], [0, 0, 1, 0], [], []>} : vector<16x16xbf16>, vector<16x16xbf16>, vector<16x16xf32> -> vector<16x16xf32>
    %cst_82 = arith.constant 2.500000e-01 : f32
    %178 = vector.broadcast %cst_82 : f32 to vector<16x16xf32>
    %179 = arith.mulf %177, %178 : vector<16x16xf32>
    %180 = arith.addf %179, %25 : vector<16x16xf32>
    %cst_83 = arith.constant dense<0xFF800000> : vector<16xf32>
    %181 = vector.multi_reduction <maximumf>, %180, %cst_83 [1] : vector<16x16xf32> to vector<16xf32>
    %182 = vector.shape_cast %181 : vector<16xf32> to vector<16x1xf32>
    %183 = vector.broadcast %182 : vector<16x1xf32> to vector<16x16xf32>
    %184 = arith.subf %180, %183 : vector<16x16xf32>
    %185 = math.exp %184 : vector<16x16xf32>
    %cst_84 = arith.constant dense<0.000000e+00> : vector<16xf32>
    %186 = vector.multi_reduction <add>, %185, %cst_84 [1] : vector<16x16xf32> to vector<16xf32>
    %187 = vector.shape_cast %186 : vector<16xf32> to vector<16x1xf32>
    %188 = tpu.reciprocal %187 {approx = true} : vector<16x1xf32> -> vector<16x1xf32>
    %189 = vector.broadcast %188 : vector<16x1xf32> to vector<16x16xf32>
    %190 = arith.mulf %185, %189 : vector<16x16xf32>
    %191 = arith.truncf %190 : vector<16x16xf32> to vector<16x16xbf16>
    %cst_85 = arith.constant dense<0.000000e+00> : vector<16x16xf32>
    %192 = tpu.matmul %191, %176, %cst_85 {dimension_numbers = #tpu.dot_dimension_numbers<[1], [0], [0], [1], [0, 0, 1, 1], [], []>} : vector<16x16xbf16>, vector<16x16xbf16>, vector<16x16xf32> -> vector<16x16xf32>
    %193 = vector.extract_strided_slice %173 {offsets = [0, 16], sizes = [16, 16], strides = [1, 1]} : vector<16x96xbf16> to vector<16x16xbf16>
    %194 = vector.extract_strided_slice %173 {offsets = [0, 48], sizes = [16, 16], strides = [1, 1]} : vector<16x96xbf16> to vector<16x16xbf16>
    %195 = vector.extract_strided_slice %173 {offsets = [0, 80], sizes = [16, 16], strides = [1, 1]} : vector<16x96xbf16> to vector<16x16xbf16>
    %cst_86 = arith.constant dense<0.000000e+00> : vector<16x16xf32>
    %196 = tpu.matmul %193, %194, %cst_86 {dimension_numbers = #tpu.dot_dimension_numbers<[1], [1], [0], [0], [0, 0, 1, 0], [], []>} : vector<16x16xbf16>, vector<16x16xbf16>, vector<16x16xf32> -> vector<16x16xf32>
    %cst_87 = arith.constant 2.500000e-01 : f32
    %197 = vector.broadcast %cst_87 : f32 to vector<16x16xf32>
    %198 = arith.mulf %196, %197 : vector<16x16xf32>
    %199 = arith.addf %198, %25 : vector<16x16xf32>
    %cst_88 = arith.constant dense<0xFF800000> : vector<16xf32>
    %200 = vector.multi_reduction <maximumf>, %199, %cst_88 [1] : vector<16x16xf32> to vector<16xf32>
    %201 = vector.shape_cast %200 : vector<16xf32> to vector<16x1xf32>
    %202 = vector.broadcast %201 : vector<16x1xf32> to vector<16x16xf32>
    %203 = arith.subf %199, %202 : vector<16x16xf32>
    %204 = math.exp %203 : vector<16x16xf32>
    %cst_89 = arith.constant dense<0.000000e+00> : vector<16xf32>
    %205 = vector.multi_reduction <add>, %204, %cst_89 [1] : vector<16x16xf32> to vector<16xf32>
    %206 = vector.shape_cast %205 : vector<16xf32> to vector<16x1xf32>
    %207 = tpu.reciprocal %206 {approx = true} : vector<16x1xf32> -> vector<16x1xf32>
    %208 = vector.broadcast %207 : vector<16x1xf32> to vector<16x16xf32>
    %209 = arith.mulf %204, %208 : vector<16x16xf32>
    %210 = arith.truncf %209 : vector<16x16xf32> to vector<16x16xbf16>
    %cst_90 = arith.constant dense<0.000000e+00> : vector<16x16xf32>
    %211 = tpu.matmul %210, %195, %cst_90 {dimension_numbers = #tpu.dot_dimension_numbers<[1], [0], [0], [1], [0, 0, 1, 1], [], []>} : vector<16x16xbf16>, vector<16x16xbf16>, vector<16x16xf32> -> vector<16x16xf32>
    %212 = tpu.concatenate %192, %211 in 1 : vector<16x16xf32>, vector<16x16xf32> -> vector<16x32xf32>
    %213 = arith.truncf %212 : vector<16x32xf32> to vector<16x32xbf16>
    %c1_91 = arith.constant 1 : index
    %c0_92 = arith.constant 0 : index
    %c0_93 = arith.constant 0 : index
    %214 = vector.load %arg7[%c1_91, %c0_92, %c0_93] : memref<2x32x32xbf16, #tpu.memory_space<vmem>>, vector<1x32x32xbf16>
    %215 = vector.shape_cast %214 : vector<1x32x32xbf16> to vector<32x32xbf16>
    %cst_94 = arith.constant dense<0.000000e+00> : vector<16x32xf32>
    %216 = tpu.matmul %213, %215, %cst_94 {dimension_numbers = #tpu.dot_dimension_numbers<[1], [0], [0], [1], [0, 0, 1, 1], [], []>} : vector<16x32xbf16>, vector<32x32xbf16>, vector<16x32xf32> -> vector<16x32xf32>
    %c1_95 = arith.constant 1 : index
    %c0_96 = arith.constant 0 : index
    %c0_97 = arith.constant 0 : index
    %217 = vector.load %arg8[%c1_95, %c0_96, %c0_97] : memref<2x1x32xf32, #tpu.memory_space<vmem>>, vector<1x1x32xf32>
    %218 = vector.shape_cast %217 : vector<1x1x32xf32> to vector<1x32xf32>
    %219 = vector.broadcast %218 : vector<1x32xf32> to vector<16x32xf32>
    %220 = arith.addf %216, %219 : vector<16x32xf32>
    %221 = arith.addf %220, %164 : vector<16x32xf32>
    %c1_98 = arith.constant 1 : index
    %c0_99 = arith.constant 0 : index
    %c0_100 = arith.constant 0 : index
    %222 = vector.load %arg9[%c1_98, %c0_99, %c0_100] : memref<2x1x32xf32, #tpu.memory_space<vmem>>, vector<1x1x32xf32>
    %223 = vector.shape_cast %222 : vector<1x1x32xf32> to vector<1x32xf32>
    %c1_101 = arith.constant 1 : index
    %c0_102 = arith.constant 0 : index
    %c0_103 = arith.constant 0 : index
    %224 = vector.load %arg10[%c1_101, %c0_102, %c0_103] : memref<2x1x32xf32, #tpu.memory_space<vmem>>, vector<1x1x32xf32>
    %225 = vector.shape_cast %224 : vector<1x1x32xf32> to vector<1x32xf32>
    %cst_104 = arith.constant dense<0.000000e+00> : vector<16xf32>
    %226 = vector.multi_reduction <add>, %221, %cst_104 [1] : vector<16x32xf32> to vector<16xf32>
    %227 = vector.shape_cast %226 : vector<16xf32> to vector<16x1xf32>
    %cst_105 = arith.constant 3.200000e+01 : f32
    %228 = vector.broadcast %cst_105 : f32 to vector<16x1xf32>
    %229 = arith.divf %227, %228 : vector<16x1xf32>
    %230 = vector.broadcast %229 : vector<16x1xf32> to vector<16x32xf32>
    %231 = arith.subf %221, %230 : vector<16x32xf32>
    %232 = arith.mulf %231, %231 : vector<16x32xf32>
    %cst_106 = arith.constant dense<0.000000e+00> : vector<16xf32>
    %233 = vector.multi_reduction <add>, %232, %cst_106 [1] : vector<16x32xf32> to vector<16xf32>
    %234 = vector.shape_cast %233 : vector<16xf32> to vector<16x1xf32>
    %cst_107 = arith.constant 3.200000e+01 : f32
    %235 = vector.broadcast %cst_107 : f32 to vector<16x1xf32>
    %236 = arith.divf %234, %235 : vector<16x1xf32>
    %237 = vector.broadcast %229 : vector<16x1xf32> to vector<16x32xf32>
    %238 = arith.subf %221, %237 : vector<16x32xf32>
    %cst_108 = arith.constant 9.99999996E-13 : f32
    %239 = vector.broadcast %cst_108 : f32 to vector<16x1xf32>
    %240 = arith.addf %236, %239 : vector<16x1xf32>
    %241 = math.rsqrt %240 : vector<16x1xf32>
    %242 = vector.broadcast %241 : vector<16x1xf32> to vector<16x32xf32>
    %243 = arith.mulf %238, %242 : vector<16x32xf32>
    %244 = vector.broadcast %223 : vector<1x32xf32> to vector<16x32xf32>
    %245 = arith.mulf %243, %244 : vector<16x32xf32>
    %246 = vector.broadcast %225 : vector<1x32xf32> to vector<16x32xf32>
    %247 = arith.addf %245, %246 : vector<16x32xf32>
    %248 = arith.truncf %247 : vector<16x32xf32> to vector<16x32xbf16>
    %c1_109 = arith.constant 1 : index
    %c0_110 = arith.constant 0 : index
    %c0_111 = arith.constant 0 : index
    %249 = vector.load %arg11[%c1_109, %c0_110, %c0_111] : memref<2x32x64xbf16, #tpu.memory_space<vmem>>, vector<1x32x64xbf16>
    %250 = vector.shape_cast %249 : vector<1x32x64xbf16> to vector<32x64xbf16>
    %cst_112 = arith.constant dense<0.000000e+00> : vector<16x64xf32>
    %251 = tpu.matmul %248, %250, %cst_112 {dimension_numbers = #tpu.dot_dimension_numbers<[1], [0], [0], [1], [0, 0, 1, 1], [], []>} : vector<16x32xbf16>, vector<32x64xbf16>, vector<16x64xf32> -> vector<16x64xf32>
    %c1_113 = arith.constant 1 : index
    %c0_114 = arith.constant 0 : index
    %c0_115 = arith.constant 0 : index
    %252 = vector.load %arg12[%c1_113, %c0_114, %c0_115] : memref<2x1x64xf32, #tpu.memory_space<vmem>>, vector<1x1x64xf32>
    %253 = vector.shape_cast %252 : vector<1x1x64xf32> to vector<1x64xf32>
    %254 = vector.broadcast %253 : vector<1x64xf32> to vector<16x64xf32>
    %255 = arith.addf %251, %254 : vector<16x64xf32>
    %cst_116 = arith.constant 5.000000e-01 : f32
    %256 = vector.broadcast %cst_116 : f32 to vector<16x64xf32>
    %257 = arith.mulf %256, %255 : vector<16x64xf32>
    %cst_117 = arith.constant 4.471500e-02 : f32
    %258 = vector.broadcast %cst_117 : f32 to vector<16x64xf32>
    %259 = arith.mulf %258, %255 : vector<16x64xf32>
    %260 = arith.mulf %259, %255 : vector<16x64xf32>
    %261 = arith.mulf %260, %255 : vector<16x64xf32>
    %262 = arith.addf %255, %261 : vector<16x64xf32>
    %cst_118 = arith.constant 0.797884583 : f32
    %263 = vector.broadcast %cst_118 : f32 to vector<16x64xf32>
    %264 = arith.mulf %263, %262 : vector<16x64xf32>
    %265 = math.tanh %264 : vector<16x64xf32>
    %cst_119 = arith.constant 1.000000e+00 : f32
    %266 = vector.broadcast %cst_119 : f32 to vector<16x64xf32>
    %267 = arith.addf %266, %265 : vector<16x64xf32>
    %268 = arith.mulf %257, %267 : vector<16x64xf32>
    %269 = arith.truncf %268 : vector<16x64xf32> to vector<16x64xbf16>
    %c1_120 = arith.constant 1 : index
    %c0_121 = arith.constant 0 : index
    %c0_122 = arith.constant 0 : index
    %270 = vector.load %arg13[%c1_120, %c0_121, %c0_122] : memref<2x64x32xbf16, #tpu.memory_space<vmem>>, vector<1x64x32xbf16>
    %271 = vector.shape_cast %270 : vector<1x64x32xbf16> to vector<64x32xbf16>
    %cst_123 = arith.constant dense<0.000000e+00> : vector<16x32xf32>
    %272 = tpu.matmul %269, %271, %cst_123 {dimension_numbers = #tpu.dot_dimension_numbers<[1], [0], [0], [1], [0, 0, 1, 1], [], []>} : vector<16x64xbf16>, vector<64x32xbf16>, vector<16x32xf32> -> vector<16x32xf32>
    %c1_124 = arith.constant 1 : index
    %c0_125 = arith.constant 0 : index
    %c0_126 = arith.constant 0 : index
    %273 = vector.load %arg14[%c1_124, %c0_125, %c0_126] : memref<2x1x32xf32, #tpu.memory_space<vmem>>, vector<1x1x32xf32>
    %274 = vector.shape_cast %273 : vector<1x1x32xf32> to vector<1x32xf32>
    %275 = vector.broadcast %274 : vector<1x32xf32> to vector<16x32xf32>
    %276 = arith.addf %272, %275 : vector<16x32xf32>
    %277 = arith.addf %276, %247 : vector<16x32xf32>
    %c1_127 = arith.constant 1 : index
    %c0_128 = arith.constant 0 : index
    %c0_129 = arith.constant 0 : index
    %278 = vector.load %arg15[%c1_127, %c0_128, %c0_129] : memref<2x1x32xf32, #tpu.memory_space<vmem>>, vector<1x1x32xf32>
    %279 = vector.shape_cast %278 : vector<1x1x32xf32> to vector<1x32xf32>
    %c1_130 = arith.constant 1 : index
    %c0_131 = arith.constant 0 : index
    %c0_132 = arith.constant 0 : index
    %280 = vector.load %arg16[%c1_130, %c0_131, %c0_132] : memref<2x1x32xf32, #tpu.memory_space<vmem>>, vector<1x1x32xf32>
    %281 = vector.shape_cast %280 : vector<1x1x32xf32> to vector<1x32xf32>
    %cst_133 = arith.constant dense<0.000000e+00> : vector<16xf32>
    %282 = vector.multi_reduction <add>, %277, %cst_133 [1] : vector<16x32xf32> to vector<16xf32>
    %283 = vector.shape_cast %282 : vector<16xf32> to vector<16x1xf32>
    %cst_134 = arith.constant 3.200000e+01 : f32
    %284 = vector.broadcast %cst_134 : f32 to vector<16x1xf32>
    %285 = arith.divf %283, %284 : vector<16x1xf32>
    %286 = vector.broadcast %285 : vector<16x1xf32> to vector<16x32xf32>
    %287 = arith.subf %277, %286 : vector<16x32xf32>
    %288 = arith.mulf %287, %287 : vector<16x32xf32>
    %cst_135 = arith.constant dense<0.000000e+00> : vector<16xf32>
    %289 = vector.multi_reduction <add>, %288, %cst_135 [1] : vector<16x32xf32> to vector<16xf32>
    %290 = vector.shape_cast %289 : vector<16xf32> to vector<16x1xf32>
    %cst_136 = arith.constant 3.200000e+01 : f32
    %291 = vector.broadcast %cst_136 : f32 to vector<16x1xf32>
    %292 = arith.divf %290, %291 : vector<16x1xf32>
    %293 = vector.broadcast %285 : vector<16x1xf32> to vector<16x32xf32>
    %294 = arith.subf %277, %293 : vector<16x32xf32>
    %cst_137 = arith.constant 9.99999996E-13 : f32
    %295 = vector.broadcast %cst_137 : f32 to vector<16x1xf32>
    %296 = arith.addf %292, %295 : vector<16x1xf32>
    %297 = math.rsqrt %296 : vector<16x1xf32>
    %298 = vector.broadcast %297 : vector<16x1xf32> to vector<16x32xf32>
    %299 = arith.mulf %294, %298 : vector<16x32xf32>
    %300 = vector.broadcast %279 : vector<1x32xf32> to vector<16x32xf32>
    %301 = arith.mulf %299, %300 : vector<16x32xf32>
    %302 = vector.broadcast %281 : vector<1x32xf32> to vector<16x32xf32>
    %303 = arith.addf %301, %302 : vector<16x32xf32>
    %304 = vector.extract_strided_slice %303 {offsets = [0, 0], sizes = [1, 32], strides = [1, 1]} : vector<16x32xf32> to vector<1x32xf32>
    %305 = vector.extract_strided_slice %303 {offsets = [8, 0], sizes = [1, 32], strides = [1, 1]} : vector<16x32xf32> to vector<1x32xf32>
    %306 = tpu.concatenate %304, %305 in 0 : vector<1x32xf32>, vector<1x32xf32> -> vector<2x32xf32>
    %307 = arith.truncf %306 : vector<2x32xf32> to vector<2x32xbf16>
    %c0_138 = arith.constant 0 : index
    %c0_139 = arith.constant 0 : index
    %308 = vector.load %arg17[%c0_138, %c0_139] : memref<32x32xbf16, #tpu.memory_space<vmem>>, vector<32x32xbf16>
    %cst_140 = arith.constant dense<0.000000e+00> : vector<2x32xf32>
    %309 = tpu.matmul %307, %308, %cst_140 {dimension_numbers = #tpu.dot_dimension_numbers<[1], [0], [0], [1], [0, 0, 1, 1], [], []>} : vector<2x32xbf16>, vector<32x32xbf16>, vector<2x32xf32> -> vector<2x32xf32>
    %c0_141 = arith.constant 0 : index
    %c0_142 = arith.constant 0 : index
    %310 = vector.load %arg18[%c0_141, %c0_142] : memref<1x32xf32, #tpu.memory_space<vmem>>, vector<1x32xf32>
    %311 = vector.broadcast %310 : vector<1x32xf32> to vector<2x32xf32>
    %312 = arith.addf %309, %311 : vector<2x32xf32>
    %313 = math.tanh %312 : vector<2x32xf32>
    %c0_143 = arith.constant 0 : index
    %c0_144 = arith.constant 0 : index
    %314 = vector.load %arg19[%c0_143, %c0_144] : memref<2x32xf32, #tpu.memory_space<vmem>>, vector<2x32xf32>
    tpu.vector_store %arg19[%c0_143, %c0_144], %313 {strides = array<i32>} : memref<2x32xf32, #tpu.memory_space<vmem>>, vector<2x32xf32>,
    return
  }
  func.func @transform_0(%arg0: i32) -> (i32, i32) {
    %c0_i32 = arith.constant 0 : i32
    %c0_i32_0 = arith.constant 0 : i32
    %c0_i32_1 = arith.constant 0 : i32
    return %c0_i32, %c0_i32_0 : i32, i32
  }
  func.func @transform_1(%arg0: i32) -> (i32, i32) {
    %c0_i32 = arith.constant 0 : i32
    %c0_i32_0 = arith.constant 0 : i32
    %c0_i32_1 = arith.constant 0 : i32
    return %c0_i32, %c0_i32_0 : i32, i32
  }
  func.func @transform_2(%arg0: i32) -> (i32, i32) {
    %c0_i32 = arith.constant 0 : i32
    %c0_i32_0 = arith.constant 0 : i32
    %c0_i32_1 = arith.constant 0 : i32
    return %c0_i32, %c0_i32_0 : i32, i32
  }
  func.func @transform_3(%arg0: i32) -> (i32, i32) {
    %c0_i32 = arith.constant 0 : i32
    %c0_i32_0 = arith.constant 0 : i32
    %c0_i32_1 = arith.constant 0 : i32
    return %c0_i32, %c0_i32_0 : i32, i32
  }
  func.func @transform_4(%arg0: i32) -> (i32, i32, i32) {
    %c0_i32 = arith.constant 0 : i32
    %c0_i32_0 = arith.constant 0 : i32
    %c0_i32_1 = arith.constant 0 : i32
    %c0_i32_2 = arith.constant 0 : i32
    return %c0_i32, %c0_i32_0, %c0_i32_1 : i32, i32, i32
  }
  func.func @transform_5(%arg0: i32) -> (i32, i32, i32) {
    %c0_i32 = arith.constant 0 : i32
    %c0_i32_0 = arith.constant 0 : i32
    %c0_i32_1 = arith.constant 0 : i32
    %c0_i32_2 = arith.constant 0 : i32
    return %c0_i32, %c0_i32_0, %c0_i32_1 : i32, i32, i32
  }
  func.func @transform_6(%arg0: i32) -> (i32, i32, i32) {
    %c0_i32 = arith.constant 0 : i32
    %c0_i32_0 = arith.constant 0 : i32
    %c0_i32_1 = arith.constant 0 : i32
    %c0_i32_2 = arith.constant 0 : i32
    return %c0_i32, %c0_i32_0, %c0_i32_1 : i32, i32, i32
  }
  func.func @transform_7(%arg0: i32) -> (i32, i32, i32) {
    %c0_i32 = arith.constant 0 : i32
    %c0_i32_0 = arith.constant 0 : i32
    %c0_i32_1 = arith.constant 0 : i32
    %c0_i32_2 = arith.constant 0 : i32
    return %c0_i32, %c0_i32_0, %c0_i32_1 : i32, i32, i32
  }
  func.func @transform_8(%arg0: i32) -> (i32, i32, i32) {
    %c0_i32 = arith.constant 0 : i32
    %c0_i32_0 = arith.constant 0 : i32
    %c0_i32_1 = arith.constant 0 : i32
    %c0_i32_2 = arith.constant 0 : i32
    return %c0_i32, %c0_i32_0, %c0_i32_1 : i32, i32, i32
  }
  func.func @transform_9(%arg0: i32) -> (i32, i32, i32) {
    %c0_i32 = arith.constant 0 : i32
    %c0_i32_0 = arith.constant 0 : i32
    %c0_i32_1 = arith.constant 0 : i32
    %c0_i32_2 = arith.constant 0 : i32
    return %c0_i32, %c0_i32_0, %c0_i32_1 : i32, i32, i32
  }
  func.func @transform_10(%arg0: i32) -> (i32, i32, i32) {
    %c0_i32 = arith.constant 0 : i32
    %c0_i32_0 = arith.constant 0 : i32
    %c0_i32_1 = arith.constant 0 : i32
    %c0_i32_2 = arith.constant 0 : i32
    return %c0_i32, %c0_i32_0, %c0_i32_1 : i32, i32, i32
  }
  func.func @transform_11(%arg0: i32) -> (i32, i32, i32) {
    %c0_i32 = arith.constant 0 : i32
    %c0_i32_0 = arith.constant 0 : i32
    %c0_i32_1 = arith.constant 0 : i32
    %c0_i32_2 = arith.constant 0 : i32
    return %c0_i32, %c0_i32_0, %c0_i32_1 : i32, i32, i32
  }
  func.func @transform_12(%arg0: i32) -> (i32, i32, i32) {
    %c0_i32 = arith.constant 0 : i32
    %c0_i32_0 = arith.constant 0 : i32
    %c0_i32_1 = arith.constant 0 : i32
    %c0_i32_2 = arith.constant 0 : i32
    return %c0_i32, %c0_i32_0, %c0_i32_1 : i32, i32, i32
  }
  func.func @transform_13(%arg0: i32) -> (i32, i32, i32) {
    %c0_i32 = arith.constant 0 : i32
    %c0_i32_0 = arith.constant 0 : i32
    %c0_i32_1 = arith.constant 0 : i32
    %c0_i32_2 = arith.constant 0 : i32
    return %c0_i32, %c0_i32_0, %c0_i32_1 : i32, i32, i32
  }
  func.func @transform_14(%arg0: i32) -> (i32, i32, i32) {
    %c0_i32 = arith.constant 0 : i32
    %c0_i32_0 = arith.constant 0 : i32
    %c0_i32_1 = arith.constant 0 : i32
    %c0_i32_2 = arith.constant 0 : i32
    return %c0_i32, %c0_i32_0, %c0_i32_1 : i32, i32, i32
  }
  func.func @transform_15(%arg0: i32) -> (i32, i32, i32) {
    %c0_i32 = arith.constant 0 : i32
    %c0_i32_0 = arith.constant 0 : i32
    %c0_i32_1 = arith.constant 0 : i32
    %c0_i32_2 = arith.constant 0 : i32
    return %c0_i32, %c0_i32_0, %c0_i32_1 : i32, i32, i32
  }
  func.func @transform_16(%arg0: i32) -> (i32, i32) {
    %c0_i32 = arith.constant 0 : i32
    %c0_i32_0 = arith.constant 0 : i32
    %c0_i32_1 = arith.constant 0 : i32
    return %c0_i32, %c0_i32_0 : i32, i32
  }
  func.func @transform_17(%arg0: i32) -> (i32, i32) {
    %c0_i32 = arith.constant 0 : i32
    %c0_i32_0 = arith.constant 0 : i32
    %c0_i32_1 = arith.constant 0 : i32
    return %c0_i32, %c0_i32_0 : i32, i32
  }
  func.func @transform_18(%arg0: i32) -> (i32, i32) {
    %c0_i32 = arith.constant 0 : i32
    %c0_i32_0 = arith.constant 0 : i32
    %c0_i32_1 = arith.constant 0 : i32
    return %c0_i32, %c0_i32_0 : i32, i32
  }
}

</mosaic_0001>

<bundles_post_ra>
// kernel: bert_pooled.1
= control target key start
LH: loop header
LB: loop body
LE: loop exit
PB: predicated region body
PF: predicated region fallthrough
CT: control target
= control target key end

     0   :  { %s1776_s0 = inlined_call_operand.vmem [shape: f32[16,32], index: 0, kind: input, shape index: {}]   ;;  %s1777_s1 = inlined_call_operand.vmem [shape: f32[16,16], index: 1, kind: input, shape index: {}]   ;;  %s1778_s2 = inlined_call_operand.vmem [shape: f32[1,32], index: 2, kind: input, shape index: {}]   ;;  %s1779_s3 = inlined_call_operand.vmem [shape: f32[1,32], index: 3, kind: input, shape index: {}]   ;;  %s1780_s4 = inlined_call_operand.vmem [shape: bf16[2,32,96], index: 4, kind: input, shape index: {}]   ;;  %s1781_s5 = inlined_call_operand.vmem [shape: f32[2,1,96], index: 5, kind: input, shape index: {}]   ;;  %s1782_s6 = inlined_call_operand.vmem [shape: bf16[2,32,32], index: 6, kind: input, shape index: {}]   ;;  %s1783_s7 = inlined_call_operand.vmem [shape: f32[2,1,32], index: 7, kind: input, shape index: {}]   ;;  %s1784_s8 = inlined_call_operand.vmem [shape: f32[2,1,32], index: 8, kind: input, shape index: {}]   ;;  %s1785_s9 = inlined_call_operand.vmem [shape: f32[2,1,32], index: 9, kind: input, shape index: {}]   ;;  %s1786_s10 = inlined_call_operand.vmem [shape: bf16[2,32,64], index: 10, kind: input, shape index: {}]   ;;  %s1787_s11 = inlined_call_operand.vmem [shape: f32[2,1,64], index: 11, kind: input, shape index: {}]   ;;  %s1788_s12 = inlined_call_operand.vmem [shape: bf16[2,64,32], index: 12, kind: input, shape index: {}]   ;;  %s1789_s13 = inlined_call_operand.vmem [shape: f32[2,1,32], index: 13, kind: input, shape index: {}]   ;;  %s1790_s14 = inlined_call_operand.vmem [shape: f32[2,1,32], index: 14, kind: input, shape index: {}]   ;;  %s1791_s15 = inlined_call_operand.vmem [shape: f32[2,1,32], index: 15, kind: input, shape index: {}]   ;;  %s1792_s16 = inlined_call_operand.vmem [shape: bf16[32,32], index: 16, kind: input, shape index: {}]   ;;  %s1793_s17 = inlined_call_operand.vmem [shape: f32[1,32], index: 17, kind: input, shape index: {}]   ;;  %s1794_s18 = inlined_call_operand.hbm [shape: f32[2,32], index: 18, kind: output, shape index: {}]  }
   0x1   :  { %1797 = sst [smem:[#allocation5_spill]] %s1776_s0 }
   0x2   :  { %1798 = sst [smem:[#allocation6_spill]] %s1777_s1 }
   0x3   :  { %1799 = sst [smem:[#allocation7_spill]] %s1778_s2 }
   0x4   :  { %s1800_s29 = sld [smem:[#allocation5_spill]]  ;;  %vm65_vm0 = vcmask 261120  }
   0xa   :  { %v61_v0 = vld [vmem:[%s1800_s29] sm:$0xff]  ;;  %v62_v2 = vld [vmem:[%s1800_s29 + $0x8] sm:$0xff] }
   0xb   :  { %v66_v1 = vsel %vm65_vm0, %v61_v0, 0.0  ;;  %v69_v3 = vsel %vm65_vm0, %v62_v2, 0.0 }
   0xc   :  { %67 = vadd.xlane.f32.xlu0 %v66_v1 }
   0xd   :  { %23 = vsyncpa [#allocation3], 0  ;;  %v1404_v4 = vmov 32.0   ;;  %v1256_v21 = vld [vmem:[%s1780_s4 + $0x8] sm:$0xff]  ;;  %v1255_v23 = vld [vmem:[%s1780_s4] sm:$0xff]  ;;  %s1801_s23 = sld [smem:[#allocation7_spill]] }
   0xe   :  { %1314 = vrcp.f32 %v1404_v4  ;;  %159 = vmatpush.bf16.msra.mxu0 %v1256_v21  ;;  %v1296_v47 = vld [vmem:[%s1779_s3] ss:$0 sm:$0xff]  ;;  %s1405_s3 = smov 112   ;;  %s1406_s28 = smov 96   ;;  %vm176_vm8 = vcmask 130048   ;;  %vm514_vm15 = vcmask 523264  }
   0xf   :  { %v1297_v53 = vld [vmem:[%s1781_s5] ss:$0 sm:$0xff]  ;;  %s1407_s29 = smov 80   ;;  %s1802_s19 = sld [smem:[#allocation6_spill]] }
  0x10   :  { %s1408_s21 = smov 64   ;;  %s1409_s22 = smov 48  }
  0x11   :  { %s1410_s24 = smov 16   ;;  %s1113_s0 = sshll.u32 %s1794_s18, 4  ;;  %s1114_s0 = int_to_ptr.hbm [resolvable:$true] %s1113_s0 }
  0x12   :  { %160 = vmatpush.bf16.msra.mxu0 %v1255_v23 }
  0x13   :  { %v1295_v42 = vld [vmem:[%s1801_s23] ss:$0 sm:$0xff] }
  0x14   :  { %70 = vadd.xlane.f32.xlu0 %v69_v3  ;;  %v1315_v5 = vpop.eup %1314 }
  0x15   :  { %v73_v6 = vmul.f32 32.0, %v1315_v5  ;;  %vm77_vm1 = vweird.f32 %v1315_v5  ;;  %v1561_v4 = vld [vmem:[%s1802_s19] sm:$0xff] }
  0x17   :  { %v74_v7 = vsub.f32 1.0, %v73_v6 }
  0x19   :  { %v75_v8 = vmul.f32 %v1315_v5, %v74_v7 }
  0x1b   :  { %v76_v9 = vadd.f32 %v1315_v5, %v75_v8 }
  0x1d   :  { %v1515_v10 = vsel %vm77_vm1, %v1315_v5, %v76_v9  ;;  %v1568_v9 = vld [vmem:[%s1802_s19 + $0x8] sm:$0xff] }
  0x7f   :  { %v68_v11 = vpop.xlane.xlu0 %67 }
  0x80   :  { %v79_v12 = vmul.f32 %v1515_v10, %v68_v11 }
  0x82   :  { %v81_v13 = vsub.f32 %v61_v0, %v79_v12 }
  0x84   :  { %v83_v14 = vmul.f32 %v81_v13, %v81_v13 }
  0x86   :  { %v85_v15 = vsel %vm65_vm0, %v83_v14, 0.0 }
  0x87   :  { %86 = vadd.xlane.f32.xlu1 %v85_v15  ;;  %v71_v16 = vpop.xlane.xlu0 %70 }
  0x88   :  { %v80_v17 = vmul.f32 %v1515_v10, %v71_v16 }
  0x8a   :  { %v82_v18 = vsub.f32 %v62_v2, %v80_v17 }
  0x8c   :  { %v84_v19 = vmul.f32 %v82_v18, %v82_v18 }
  0x8e   :  { %v88_v20 = vsel %vm65_vm0, %v84_v19, 0.0 }
  0x8f   :  { %89 = vadd.xlane.f32.xlu1 %v88_v20 }
  0xfa   :  { %v87_v22 = vpop.xlane.xlu1 %86 }
  0xfb   :  { %v91_v24 = vmul.f32 %v87_v22, %v1515_v10 }
  0xfd   :  { %v93_v25 = vadd.f32 1e-12, %v91_v24 }
  0xff   :  { %1316 = vrsqrt.f32 %v93_v25  ;;  %vm101_vm3 = vweird.f32 %v93_v25 }
 0x102   :  { %v90_v26 = vpop.xlane.xlu1 %89 }
 0x103   :  { %v92_v27 = vmul.f32 %v90_v26, %v1515_v10 }
 0x105   :  { %v1317_v28 = vpop.eup %1316  ;;  %v94_v29 = vadd.f32 1e-12, %v92_v27 }
 0x106   :  { %v96_v30 = vmul.f32 %v1317_v28, %v93_v25  ;;  %vm102_vm2 = vweird.f32 %v1317_v28 }
 0x107   :  { %1318 = vrsqrt.f32 %v94_v29  ;;  %vm103_vm4 = vmor %vm101_vm3, %vm102_vm2  ;;  %vm111_vm6 = vweird.f32 %v94_v29 }
 0x108   :  { %v97_v31 = vmul.f32 %v1317_v28, %v96_v30 }
 0x10a   :  { %v98_v32 = vmul.f32 0.5, %v97_v31 }
 0x10c   :  { %v99_v33 = vsub.f32 1.5, %v98_v32 }
 0x10d   :  { %v1319_v34 = vpop.eup %1318 }
 0x10e   :  { %v100_v35 = vmul.f32 %v1317_v28, %v99_v33  ;;  %v106_v36 = vmul.f32 %v1319_v34, %v94_v29  ;;  %vm112_vm5 = vweird.f32 %v1319_v34 }
 0x10f   :  { %vm113_vm7 = vmor %vm111_vm6, %vm112_vm5 }
 0x110   :  { %v107_v37 = vmul.f32 %v1319_v34, %v106_v36  ;;  %v104_v38 = vsel %vm103_vm4, %v1317_v28, %v100_v35 }
 0x111   :  { %v115_v41 = vmul.f32 %v104_v38, %v81_v13 }
 0x112   :  { %v108_v39 = vmul.f32 0.5, %v107_v37 }
 0x113   :  { %v120_v46 = vmul.f32 %v1295_v42, %v115_v41 }
 0x114   :  { %v109_v40 = vsub.f32 1.5, %v108_v39 }
 0x115   :  { %v1535_v49 = vadd.f32 %v1296_v47, %v120_v46 }
 0x116   :  { %v110_v43 = vmul.f32 %v1319_v34, %v109_v40 }
 0x118   :  { %v114_v44 = vsel %vm113_vm7, %v1319_v34, %v110_v43 }
 0x119   :  { %v116_v45 = vmul.f32 %v114_v44, %v82_v18 }
 0x11b   :  { %v121_v48 = vmul.f32 %v1295_v42, %v116_v45 }
 0x11d   :  { %v1537_v50 = vadd.f32 %v1296_v47, %v121_v48 }
 0x11f   :  { %v129_v51 = vpack.c.bf16 %v1537_v50, %v1535_v49 }
 0x121   :  { %1130 = vmatmul.msk.bf16.vlgmr.msra.gmra.mxu0 %vm65_vm0, %v129_v51 }
 0x19e   :  { %v162_v52 = vpop.f32.mrf.mxu0 }
 0x19f   :  { %v163_v54 = vadd.f32 %v1297_v53, %v162_v52 }
 0x1a1   :  { %v167_v56 = vpack.c.bf16 %v163_v54, %v163_v54 }
 0x1a3   :  { %v171_v59 = vunpack.c.l.b16 %v167_v56 }
 0x1a6   :  { %v164_v55 = vpop.f32.mrf.mxu0 }
 0x1a7   :  { %v165_v57 = vadd.f32 %v1297_v53, %v164_v55 }
 0x1a9   :  { %v168_v58 = vpack.c.bf16 %v165_v57, %v165_v57 }
 0x1ab   :  { %v172_v60 = vunpack.c.l.b16 %v168_v58 }
 0x1ad   :  { %v1545_v61 = vpack.c.b16 %v172_v60, %v171_v59  ;;  %v1258_v60 = vld [vmem:[%s1782_s6 + $0x8] sm:$0xff] }
 0x1ae   :  { %355 = vmatpush.bf16.msrb.mxu0 %v1258_v60 }
 0x1af   :  { %244 = vrot.lane.b32.xlu0 %v1545_v61, %s1405_s3  ;;  %174 = vrot.lane.b32.xlu2 %v1545_v61, %s1406_s28 }
 0x1b7   :  { %246 = vrot.lane.b32.xlu2 %v1545_v61, %s1407_s29 }
 0x209   :  { %v175_v62 = vpop.permute.xlu2 %174 }
 0x20a   :  { %v181_v63 = vsel %vm176_vm8, %v175_v62, 0 }
 0x20b   :  { %190 = vmatpush.bf16.xpose.msra.mxu1 %v181_v63 }
 0x211   :  { %v247_v0 = vpop.permute.xlu2 %246 }
 0x212   :  { %1131 = vmatmul.msk.bf16.vlgmr.msra.gmra.mxu1 %vm176_vm8, %v1545_v61  ;;  %v252_v1 = vsel %vm176_vm8, %v247_v0, 0 }
 0x213   :  { %261 = vmatpush.bf16.xpose.msra.mxu3 %v252_v1 }
 0x221   :  { %v245_v2 = vpop.permute.xlu0 %244 }
 0x222   :  { %1133 = vmatmul.msk.bf16.vlgmr.msra.gmra.mxu3 %vm176_vm8, %v245_v2  ;;  %v1257_v2 = vld [vmem:[%s1782_s6] sm:$0xff] }
 0x223   :  { %356 = vmatpush.bf16.msrb.mxu0 %v1257_v2  ;;  %v1301_v2 = vld [vmem:[%s1787_s11] ss:$0 sm:$0xff] }
 0x28f   :  { %v192_v3 = vpop.f32.mrf.mxu1 }
 0x290   :  { %v197_v5 = vmul.f32 0.25, %v192_v3 }
 0x292   :  { %v199_v6 = vadd.f32 %v197_v5, %v1561_v4 }
 0x294   :  { %v201_v7 = vsel %vm176_vm8, %v199_v6, -inf }
 0x295   :  { %202 = vmax.xlane.f32.xlu1 %v201_v7 }
 0x297   :  { %v194_v8 = vpop.f32.mrf.mxu1 }
 0x298   :  { %v198_v11 = vmul.f32 0.25, %v194_v8 }
 0x29a   :  { %v200_v12 = vadd.f32 %v198_v11, %v1568_v9 }
 0x29c   :  { %v204_v13 = vsel %vm176_vm8, %v200_v12, -inf }
 0x29d   :  { %205 = vmax.xlane.f32.xlu2 %v204_v13 }
 0x2a5   :  { %v263_v14 = vpop.f32.mrf.mxu3 }
 0x2a6   :  { %v268_v15 = vmul.f32 0.25, %v263_v14 }
 0x2a8   :  { %v270_v16 = vadd.f32 %v268_v15, %v1561_v4 }
 0x2aa   :  { %v272_v17 = vsel %vm176_vm8, %v270_v16, -inf }
 0x2ab   :  { %273 = vmax.xlane.f32.xlu1 %v272_v17 }
 0x2ad   :  { %v265_v18 = vpop.f32.mrf.mxu3 }
 0x2ae   :  { %v269_v19 = vmul.f32 0.25, %v265_v18 }
 0x2b0   :  { %v271_v20 = vadd.f32 %v269_v19, %v1568_v9 }
 0x2b2   :  { %v275_v21 = vsel %vm176_vm8, %v271_v20, -inf }
 0x2b3   :  { %276 = vmax.xlane.f32.xlu1 %v275_v21 }
 0x2cc   :  { %224 = vrot.lane.b32.xlu1 %v1545_v61, %s1408_s21 }
 0x308   :  { %v203_v22 = vpop.xlane.xlu1 %202 }
 0x309   :  { %v207_v23 = vsub.f32 %v199_v6, %v203_v22 }
 0x30b   :  { %v209_v24 = vmul.f32 1.442695, %v207_v23 }
 0x30d   :  { %1320 = vpow2.f32 %v209_v24 }
 0x310   :  { %v206_v25 = vpop.xlane.xlu2 %205 }
 0x311   :  { %v208_v26 = vsub.f32 %v200_v12, %v206_v25  ;;  %v1298_v12 = vld [vmem:[%s1783_s7] ss:$0 sm:$0xff] }
 0x313   :  { %v1321_v27 = vpop.eup %1320  ;;  %v211_v28 = vmul.f32 1.442695, %v208_v26 }
 0x314   :  { %v213_v29 = vsel %vm176_vm8, %v1321_v27, 0.0 }
 0x315   :  { %1322 = vpow2.f32 %v211_v28  ;;  %214 = vadd.xlane.f32.xlu0 %v213_v29 }
 0x31b   :  { %v1323_v30 = vpop.eup %1322 }
 0x31c   :  { %v216_v31 = vsel %vm176_vm8, %v1323_v30, 0.0 }
 0x31d   :  { %217 = vadd.xlane.f32.xlu1 %v216_v31  ;;  %v1259_v31 = vld [vmem:[%s1786_s10] sm:$0xff] }
 0x31e   :  { %v274_v32 = vpop.xlane.xlu1 %273 }
 0x31f   :  { %v278_v33 = vsub.f32 %v270_v16, %v274_v32 }
 0x321   :  { %v280_v34 = vmul.f32 1.442695, %v278_v33 }
 0x323   :  { %1324 = vpow2.f32 %v280_v34 }
 0x326   :  { %v277_v35 = vpop.xlane.xlu1 %276 }
 0x327   :  { %v279_v36 = vsub.f32 %v271_v20, %v277_v35 }
 0x329   :  { %v1325_v37 = vpop.eup %1324  ;;  %v282_v38 = vmul.f32 1.442695, %v279_v36 }
 0x32a   :  { %v284_v39 = vsel %vm176_vm8, %v1325_v37, 0.0 }
 0x32b   :  { %1326 = vpow2.f32 %v282_v38  ;;  %285 = vadd.xlane.f32.xlu2 %v284_v39 }
 0x331   :  { %v1327_v40 = vpop.eup %1326 }
 0x332   :  { %v287_v41 = vsel %vm176_vm8, %v1327_v40, 0.0 }
 0x333   :  { %288 = vadd.xlane.f32.xlu2 %v287_v41 }
 0x336   :  { %295 = vrot.lane.b32.xlu1 %v1545_v61, %s1409_s22 }
 0x33e   :  { %v225_v42 = vpop.permute.xlu1 %224 }
 0x33f   :  { %237 = vmatpush.bf16.msra.mxu2 %v225_v42 }
 0x388   :  { %v215_v43 = vpop.xlane.xlu0 %214 }
 0x389   :  { %1328 = vrcp.f32 %v215_v43 }
 0x38f   :  { %v1329_v45 = vpop.eup %1328 }
 0x390   :  { %v218_v44 = vpop.xlane.xlu1 %217  ;;  %v221_v47 = vmul.f32 %v1329_v45, %v1321_v27 }
 0x391   :  { %1330 = vrcp.f32 %v218_v44 }
 0x397   :  { %v1331_v46 = vpop.eup %1330 }
 0x398   :  { %v222_v48 = vmul.f32 %v1331_v46, %v1323_v30 }
 0x39a   :  { %v223_v51 = vpack.c.bf16 %v222_v48, %v221_v47 }
 0x39c   :  { %1132 = vmatmul.msk.bf16.vlgmr.msra.gmra.mxu2 %vm176_vm8, %v223_v51 }
 0x39e   :  { %v286_v52 = vpop.xlane.xlu2 %285 }
 0x39f   :  { %1332 = vrcp.f32 %v286_v52  ;;  %v1299_v52 = vld [vmem:[%s1784_s8] ss:$0 sm:$0xff] }
 0x3a5   :  { %v1333_v55 = vpop.eup %1332 }
 0x3a6   :  { %v289_v53 = vpop.xlane.xlu2 %288  ;;  %v292_v57 = vmul.f32 %v1333_v55, %v1325_v37 }
 0x3a7   :  { %1334 = vrcp.f32 %v289_v53 }
 0x3a8   :  { %v296_v54 = vpop.permute.xlu1 %295 }
 0x3a9   :  { %308 = vmatpush.bf16.msrb.mxu2 %v296_v54 }
 0x3ad   :  { %v1335_v56 = vpop.eup %1334 }
 0x3ae   :  { %v293_v58 = vmul.f32 %v1335_v56, %v1327_v40 }
 0x3b0   :  { %v294_v59 = vpack.c.bf16 %v293_v58, %v292_v57  ;;  %v1300_v57 = vld [vmem:[%s1785_s9] ss:$0 sm:$0xff] }
 0x3b2   :  { %1134 = vmatmul.msk.bf16.vlgmr.msrb.gmra.mxu2 %vm176_vm8, %v294_v59 }
 0x41f   :  { %v239_v61 = vpop.f32.mrf.mxu2 }
 0x427   :  { %v241_v62 = vpop.f32.mrf.mxu2 }
 0x435   :  { %v310_v63 = vpop.f32.mrf.mxu2 }
 0x43d   :  { %v312_v0 = vpop.f32.mrf.mxu2 }
 0x43e   :  { %v1285_v1 = vpack.i.bf16 %v312_v0, %v310_v63  ;;  %v1263_v63 = vld [vmem:[%s1788_s12 + $0x10] sm:$0xff]  ;;  %v1262_v0 = vld [vmem:[%s1788_s12 + $0x8] sm:$0xff] }
 0x440   :  { %1286 = vrot.lane.b32.xlu2 %v1285_v1, %s1410_s24  ;;  %v1261_v1 = vld [vmem:[%s1788_s12] sm:$0xff] }
 0x49a   :  { %v1287_v3 = vpop.permute.xlu2 %1286 }
 0x49b   :  { %v1289_v5 = vunpack.i.h.bf16 %v1287_v3  ;;  %v1288_v6 = vunpack.i.l.bf16 %v1287_v3 }
 0x49d   :  { %v324_v7 = vsel %vm176_vm8, %v241_v62, %v1289_v5  ;;  %v323_v8 = vsel %vm176_vm8, %v239_v61, %v1288_v6  ;;  %v1264_v62 = vld [vmem:[%s1788_s12 + $0x18] sm:$0xff] }
 0x49e   :  { %v325_v11 = vpack.c.bf16 %v324_v7, %v323_v8  ;;  %522 = vmatpush.bf16.msrb.mxu3 %v1264_v62 }
 0x4a0   :  { %1143 = vmatmul.msk.bf16.vlgmr.msrb.gmra.mxu0 %vm65_vm0, %v325_v11 }
 0x4a2   :  { %523 = vmatpush.bf16.msrb.mxu3 %v1263_v63 }
 0x4a6   :  { %524 = vmatpush.bf16.msrb.mxu3 %v1262_v0 }
 0x4aa   :  { %525 = vmatpush.bf16.msrb.mxu3 %v1261_v1 }
 0x51d   :  { %v358_v13 = vpop.f32.mrf.mxu0 }
 0x51e   :  { %v359_v14 = vadd.f32 %v1298_v12, %v358_v13 }
 0x520   :  { %v363_v15 = vadd.f32 %v359_v14, %v1535_v49 }
 0x522   :  { %v367_v16 = vsel %vm65_vm0, %v363_v15, 0.0 }
 0x523   :  { %368 = vadd.xlane.f32.xlu0 %v367_v16 }
 0x525   :  { %v360_v17 = vpop.f32.mrf.mxu0 }
 0x526   :  { %v361_v18 = vadd.f32 %v1298_v12, %v360_v17 }
 0x528   :  { %v364_v19 = vadd.f32 %v361_v18, %v1537_v50  ;;  %v1260_v50 = vld [vmem:[%s1786_s10 + $0x8] sm:$0xff] }
 0x529   :  { %451 = vmatpush.bf16.msrb.mxu1 %v1260_v50 }
 0x52a   :  { %v370_v20 = vsel %vm65_vm0, %v364_v19, 0.0 }
 0x52b   :  { %371 = vadd.xlane.f32.xlu1 %v370_v20 }
 0x52d   :  { %452 = vmatpush.bf16.msrb.mxu1 %v1259_v31 }
 0x596   :  { %v369_v21 = vpop.xlane.xlu0 %368 }
 0x597   :  { %v373_v22 = vmul.f32 %v369_v21, %v1515_v10 }
 0x599   :  { %v375_v23 = vsub.f32 %v363_v15, %v373_v22 }
 0x59b   :  { %v377_v24 = vmul.f32 %v375_v23, %v375_v23 }
 0x59d   :  { %v379_v25 = vsel %vm65_vm0, %v377_v24, 0.0 }
 0x59e   :  { %v372_v26 = vpop.xlane.xlu1 %371  ;;  %380 = vadd.xlane.f32.xlu0 %v379_v25 }
 0x59f   :  { %v374_v49 = vmul.f32 %v372_v26, %v1515_v10 }
 0x5a1   :  { %v376_v27 = vsub.f32 %v364_v19, %v374_v49 }
 0x5a3   :  { %v378_v28 = vmul.f32 %v376_v27, %v376_v27 }
 0x5a5   :  { %v382_v29 = vsel %vm65_vm0, %v378_v28, 0.0  ;;  %v1302_v28 = vld [vmem:[%s1789_s13] ss:$0 sm:$0xff] }
 0x5a6   :  { %383 = vadd.xlane.f32.xlu0 %v382_v29 }
 0x611   :  { %v381_v30 = vpop.xlane.xlu0 %380 }
 0x612   :  { %v385_v32 = vmul.f32 %v381_v30, %v1515_v10 }
 0x614   :  { %v387_v33 = vadd.f32 1e-12, %v385_v32 }
 0x616   :  { %1336 = vrsqrt.f32 %v387_v33  ;;  %vm395_vm10 = vweird.f32 %v387_v33 }
 0x619   :  { %v384_v34 = vpop.xlane.xlu0 %383 }
 0x61a   :  { %v386_v35 = vmul.f32 %v384_v34, %v1515_v10 }
 0x61c   :  { %v1337_v36 = vpop.eup %1336  ;;  %v388_v37 = vadd.f32 1e-12, %v386_v35 }
 0x61d   :  { %v390_v38 = vmul.f32 %v1337_v36, %v387_v33  ;;  %vm396_vm9 = vweird.f32 %v1337_v36 }
 0x61e   :  { %1338 = vrsqrt.f32 %v388_v37  ;;  %vm397_vm11 = vmor %vm395_vm10, %vm396_vm9  ;;  %vm405_vm13 = vweird.f32 %v388_v37 }
 0x61f   :  { %v391_v39 = vmul.f32 %v1337_v36, %v390_v38 }
 0x621   :  { %v392_v40 = vmul.f32 0.5, %v391_v39 }
 0x623   :  { %v393_v41 = vsub.f32 1.5, %v392_v40 }
 0x624   :  { %v1339_v42 = vpop.eup %1338 }
 0x625   :  { %v394_v43 = vmul.f32 %v1337_v36, %v393_v41  ;;  %v400_v44 = vmul.f32 %v1339_v42, %v388_v37  ;;  %vm406_vm12 = vweird.f32 %v1339_v42 }
 0x626   :  { %vm407_vm14 = vmor %vm405_vm13, %vm406_vm12 }
 0x627   :  { %v401_v45 = vmul.f32 %v1339_v42, %v400_v44  ;;  %v398_v46 = vsel %vm397_vm11, %v1337_v36, %v394_v43 }
 0x628   :  { %v409_v51 = vmul.f32 %v398_v46, %v375_v23  ;;  %v1266_v46 = vld [vmem:[%s1780_s4 + $0x18] sm:$0xff] }
 0x629   :  { %v402_v47 = vmul.f32 0.5, %v401_v45  ;;  %622 = vmatpush.bf16.msra.mxu2 %v1266_v46 }
 0x62a   :  { %v414_v56 = vmul.f32 %v1299_v52, %v409_v51  ;;  %v1265_v51 = vld [vmem:[%s1780_s4 + $0x10] sm:$0xff] }
 0x62b   :  { %v403_v48 = vsub.f32 1.5, %v402_v47 }
 0x62c   :  { %v419_v59 = vadd.f32 %v1300_v57, %v414_v56 }
 0x62d   :  { %v404_v53 = vmul.f32 %v1339_v42, %v403_v48  ;;  %623 = vmatpush.bf16.msra.mxu2 %v1265_v51 }
 0x62f   :  { %v408_v54 = vsel %vm407_vm14, %v1339_v42, %v404_v53 }
 0x630   :  { %v410_v55 = vmul.f32 %v408_v54, %v376_v27 }
 0x632   :  { %v415_v58 = vmul.f32 %v1299_v52, %v410_v55 }
 0x634   :  { %v420_v60 = vadd.f32 %v1300_v57, %v415_v58 }
 0x636   :  { %v421_v61 = vpack.c.bf16 %v420_v60, %v419_v59 }
 0x638   :  { %1152 = vmatmul.msk.bf16.vlgmr.msrb.gmra.mxu1 %vm65_vm0, %v421_v61 }
 0x6b5   :  { %v454_v3 = vpop.f32.mrf.mxu1 }
 0x6b6   :  { %v455_v5 = vadd.f32 %v1301_v2, %v454_v3 }
 0x6b8   :  { %v461_v6 = vmul.f32 0.044715, %v455_v5  ;;  %v459_v23 = vmul.f32 0.5, %v455_v5 }
 0x6ba   :  { %v463_v7 = vmul.f32 %v461_v6, %v455_v5 }
 0x6bc   :  { %v465_v8 = vmul.f32 %v463_v7, %v455_v5 }
 0x6bd   :  { %v456_v11 = vpop.f32.mrf.mxu1 }
 0x6be   :  { %v467_v12 = vadd.f32 %v465_v8, %v455_v5  ;;  %v457_v13 = vadd.f32 %v1301_v2, %v456_v11  ;;  %v1303_v5 = vld [vmem:[%s1790_s14] ss:$0 sm:$0xff] }
 0x6bf   :  { %v1304_v11 = vld [vmem:[%s1791_s15] ss:$0 sm:$0xff] }
 0x6c0   :  { %v462_v14 = vmul.f32 0.044715, %v457_v13  ;;  %v469_v15 = vmul.f32 0.7978846, %v467_v12  ;;  %v460_v24 = vmul.f32 0.5, %v457_v13 }
 0x6c2   :  { %v464_v16 = vmul.f32 %v462_v14, %v457_v13  ;;  %1340 = vtanh.f32 %v469_v15 }
 0x6c4   :  { %v466_v17 = vmul.f32 %v464_v16, %v457_v13 }
 0x6c6   :  { %v468_v18 = vadd.f32 %v466_v17, %v457_v13 }
 0x6c8   :  { %v470_v19 = vmul.f32 0.7978846, %v468_v18  ;;  %v1341_v20 = vpop.eup %1340 }
 0x6c9   :  { %v473_v21 = vadd.f32 1.0, %v1341_v20 }
 0x6ca   :  { %1342 = vtanh.f32 %v470_v19  ;;  %v1305_v19 = vld [vmem:[%s1781_s5 + $0x1] ss:$0 sm:$0xff] }
 0x6cb   :  { %v475_v26 = vmul.f32 %v473_v21, %v459_v23 }
 0x6d0   :  { %v1343_v22 = vpop.eup %1342 }
 0x6d1   :  { %v474_v25 = vadd.f32 1.0, %v1343_v22 }
 0x6d3   :  { %v476_v49 = vmul.f32 %v474_v25, %v460_v24 }
 0x6d5   :  { %v477_v27 = vpack.c.bf16 %v476_v49, %v475_v26 }
 0x6d7   :  { %1169 = vmatmul.msk.bf16.vlgmr.msrb.gmra.mxu3 %vm514_vm15, %v477_v27 }
 0x75a   :  { %v527_v29 = vpop.f32.mrf.mxu3 }
 0x75b   :  { %v528_v50 = vadd.f32 %v1302_v28, %v527_v29 }
 0x75d   :  { %v532_v30 = vadd.f32 %v528_v50, %v419_v59 }
 0x75f   :  { %v536_v31 = vsel %vm65_vm0, %v532_v30, 0.0 }
 0x760   :  { %537 = vadd.xlane.f32.xlu2 %v536_v31 }
 0x762   :  { %v529_v32 = vpop.f32.mrf.mxu3 }
 0x763   :  { %v530_v33 = vadd.f32 %v1302_v28, %v529_v32 }
 0x765   :  { %v533_v34 = vadd.f32 %v530_v33, %v420_v60 }
 0x767   :  { %v539_v35 = vsel %vm65_vm0, %v533_v34, 0.0 }
 0x768   :  { %540 = vadd.xlane.f32.xlu0 %v539_v35 }
 0x7d3   :  { %v538_v36 = vpop.xlane.xlu2 %537 }
 0x7d4   :  { %v542_v37 = vmul.f32 %v538_v36, %v1515_v10 }
 0x7d6   :  { %v544_v38 = vsub.f32 %v532_v30, %v542_v37 }
 0x7d8   :  { %v546_v39 = vmul.f32 %v544_v38, %v544_v38 }
 0x7da   :  { %v548_v40 = vsel %vm65_vm0, %v546_v39, 0.0 }
 0x7db   :  { %v541_v41 = vpop.xlane.xlu0 %540  ;;  %549 = vadd.xlane.f32.xlu0 %v548_v40 }
 0x7dc   :  { %v543_v42 = vmul.f32 %v541_v41, %v1515_v10 }
 0x7de   :  { %v545_v43 = vsub.f32 %v533_v34, %v543_v42 }
 0x7e0   :  { %v547_v44 = vmul.f32 %v545_v43, %v545_v43 }
 0x7e2   :  { %v551_v45 = vsel %vm65_vm0, %v547_v44, 0.0 }
 0x7e3   :  { %552 = vadd.xlane.f32.xlu0 %v551_v45 }
 0x84e   :  { %v550_v47 = vpop.xlane.xlu0 %549 }
 0x84f   :  { %v554_v48 = vmul.f32 %v550_v47, %v1515_v10 }
 0x851   :  { %v556_v52 = vadd.f32 1e-12, %v554_v48 }
 0x853   :  { %1344 = vrsqrt.f32 %v556_v52  ;;  %vm564_vm2 = vweird.f32 %v556_v52 }
 0x856   :  { %v553_v53 = vpop.xlane.xlu0 %552 }
 0x857   :  { %v555_v54 = vmul.f32 %v553_v53, %v1515_v10 }
 0x859   :  { %v1345_v55 = vpop.eup %1344  ;;  %v557_v56 = vadd.f32 1e-12, %v555_v54 }
 0x85a   :  { %v559_v57 = vmul.f32 %v1345_v55, %v556_v52  ;;  %vm565_vm1 = vweird.f32 %v1345_v55 }
 0x85b   :  { %1346 = vrsqrt.f32 %v557_v56  ;;  %vm566_vm3 = vmor %vm564_vm2, %vm565_vm1  ;;  %vm574_vm5 = vweird.f32 %v557_v56 }
 0x85c   :  { %v560_v58 = vmul.f32 %v1345_v55, %v559_v57 }
 0x85e   :  { %v561_v59 = vmul.f32 0.5, %v560_v58 }
 0x860   :  { %v562_v60 = vsub.f32 1.5, %v561_v59 }
 0x861   :  { %v1347_v61 = vpop.eup %1346 }
 0x862   :  { %v563_v62 = vmul.f32 %v1345_v55, %v562_v60  ;;  %v569_v63 = vmul.f32 %v1347_v61, %v557_v56  ;;  %vm575_vm4 = vweird.f32 %v1347_v61 }
 0x863   :  { %vm576_vm6 = vmor %vm574_vm5, %vm575_vm4  ;;  %vm1064_vm4 = vcmask 1040384   ;;  %vm1104_vm5 = vcmask 254976  }
 0x864   :  { %v570_v0 = vmul.f32 %v1347_v61, %v569_v63  ;;  %v567_v1 = vsel %vm566_vm3, %v1345_v55, %v563_v62 }
 0x865   :  { %v578_v6 = vmul.f32 %v567_v1, %v544_v38 }
 0x866   :  { %v571_v2 = vmul.f32 0.5, %v570_v0 }
 0x867   :  { %v583_v12 = vmul.f32 %v1303_v5, %v578_v6 }
 0x868   :  { %v572_v3 = vsub.f32 1.5, %v571_v2 }
 0x869   :  { %v1661_v15 = vadd.f32 %v1304_v11, %v583_v12 }
 0x86a   :  { %v573_v7 = vmul.f32 %v1347_v61, %v572_v3 }
 0x86c   :  { %v577_v8 = vsel %vm576_vm6, %v1347_v61, %v573_v7 }
 0x86d   :  { %v579_v13 = vmul.f32 %v577_v8, %v545_v43 }
 0x86f   :  { %v584_v14 = vmul.f32 %v1303_v5, %v579_v13 }
 0x871   :  { %v1663_v16 = vadd.f32 %v1304_v11, %v584_v14 }
 0x873   :  { %v590_v17 = vpack.c.bf16 %v1663_v16, %v1661_v15 }
 0x875   :  { %1183 = vmatmul.msk.bf16.vlgmr.msra.gmra.mxu2 %vm65_vm0, %v590_v17 }
 0x8f8   :  { %v625_v18 = vpop.f32.mrf.mxu2 }
 0x8f9   :  { %v626_v20 = vadd.f32 %v1305_v19, %v625_v18 }
 0x8fb   :  { %v630_v22 = vpack.c.bf16 %v626_v20, %v626_v20 }
 0x8fd   :  { %v634_v25 = vunpack.c.l.b16 %v630_v22 }
 0x900   :  { %v627_v21 = vpop.f32.mrf.mxu2 }
 0x901   :  { %v628_v23 = vadd.f32 %v1305_v19, %v627_v21 }
 0x903   :  { %v631_v24 = vpack.c.bf16 %v628_v23, %v628_v23 }
 0x905   :  { %v635_v26 = vunpack.c.l.b16 %v631_v24  ;;  %v1268_v24 = vld [vmem:[%s1782_s6 + $0x18] sm:$0xff] }
 0x907   :  { %v636_v49 = vpack.c.b16 %v635_v26, %v634_v25 }
 0x909   :  { %637 = vrot.lane.b32.xlu2 %v636_v49, %s1406_s28  ;;  %706 = vrot.lane.b32.xlu0 %v636_v49, %s1405_s3 }
 0x90a   :  { %708 = vrot.lane.b32.xlu1 %v636_v49, %s1407_s29 }
 0x963   :  { %v638_v27 = vpop.permute.xlu2 %637 }
 0x964   :  { %v643_v28 = vsel %vm176_vm8, %v638_v27, 0  ;;  %v1267_v27 = vld [vmem:[%s1782_s6 + $0x10] sm:$0xff] }
 0x965   :  { %652 = vmatpush.bf16.xpose.msra.mxu0 %v643_v28 }
 0x96c   :  { %1184 = vmatmul.msk.bf16.vlgmr.msra.gmra.mxu0 %vm176_vm8, %v636_v49 }
 0x96d   :  { %819 = vmatpush.bf16.msrb.mxu0 %v1268_v24  ;;  %v1274_v24 = vld [vmem:[%s1788_s12 + $0x38] sm:$0xff] }
 0x971   :  { %820 = vmatpush.bf16.msrb.mxu0 %v1267_v27  ;;  %v1309_v27 = vld [vmem:[%s1787_s11 + $0x1] ss:$0 sm:$0xff] }
 0x97b   :  { %v707_v30 = vpop.permute.xlu0 %706 }
 0x97c   :  { %v709_v29 = vpop.permute.xlu1 %708 }
 0x97d   :  { %v714_v50 = vsel %vm176_vm8, %v709_v29, 0 }
 0x97e   :  { %723 = vmatpush.bf16.xpose.msra.mxu3 %v714_v50 }
 0x985   :  { %1186 = vmatmul.msk.bf16.vlgmr.msra.gmra.mxu3 %vm176_vm8, %v707_v30 }
 0x986   :  { %991 = vmatpush.bf16.msrb.mxu3 %v1274_v24 }
 0x9e9   :  { %v654_v31 = vpop.f32.mrf.mxu0 }
 0x9ea   :  { %v659_v32 = vmul.f32 0.25, %v654_v31 }
 0x9ec   :  { %v661_v33 = vadd.f32 %v659_v32, %v1561_v4 }
 0x9ee   :  { %v663_v34 = vsel %vm176_vm8, %v661_v33, -inf }
 0x9ef   :  { %664 = vmax.xlane.f32.xlu2 %v663_v34 }
 0x9f1   :  { %v656_v37 = vpop.f32.mrf.mxu0 }
 0x9f2   :  { %v660_v39 = vmul.f32 0.25, %v656_v37 }
 0x9f4   :  { %v662_v43 = vadd.f32 %v660_v39, %v1568_v9 }
 0x9f6   :  { %v666_v45 = vsel %vm176_vm8, %v662_v43, -inf }
 0xa08   :  { %v725_v35 = vpop.f32.mrf.mxu3 }
 0xa09   :  { %v730_v36 = vmul.f32 0.25, %v725_v35  ;;  %v1306_v35 = vld [vmem:[%s1783_s7 + $0x1] ss:$0 sm:$0xff] }
 0xa0b   :  { %v732_v38 = vadd.f32 %v730_v36, %v1561_v4 }
 0xa0d   :  { %v734_v40 = vsel %vm176_vm8, %v732_v38, -inf }
 0xa0e   :  { %735 = vmax.xlane.f32.xlu0 %v734_v40 }
 0xa10   :  { %v727_v41 = vpop.f32.mrf.mxu3 }
 0xa11   :  { %v731_v42 = vmul.f32 0.25, %v727_v41 }
 0xa13   :  { %v733_v44 = vadd.f32 %v731_v42, %v1568_v9 }
 0xa15   :  { %v737_v46 = vsel %vm176_vm8, %v733_v44, -inf }
 0xa16   :  { %667 = vmax.xlane.f32.xlu0 %v666_v45  ;;  %738 = vmax.xlane.f32.xlu1 %v737_v46 }
 0xa62   :  { %v665_v47 = vpop.xlane.xlu2 %664 }
 0xa63   :  { %v669_v48 = vsub.f32 %v661_v33, %v665_v47 }
 0xa65   :  { %v671_v51 = vmul.f32 1.442695, %v669_v48 }
 0xa67   :  { %1348 = vpow2.f32 %v671_v51 }
 0xa6d   :  { %v1349_v4 = vpop.eup %1348 }
 0xa6e   :  { %v675_v52 = vsel %vm176_vm8, %v1349_v4, 0.0 }
 0xa6f   :  { %676 = vadd.xlane.f32.xlu2 %v675_v52 }
 0xa81   :  { %v736_v53 = vpop.xlane.xlu0 %735 }
 0xa82   :  { %v740_v54 = vsub.f32 %v732_v38, %v736_v53 }
 0xa84   :  { %v742_v55 = vmul.f32 1.442695, %v740_v54 }
 0xa86   :  { %1350 = vpow2.f32 %v742_v55 }
 0xa87   :  { %686 = vrot.lane.b32.xlu2 %v636_v49, %s1408_s21 }
 0xa89   :  { %v739_v9 = vpop.xlane.xlu1 %738  ;;  %v668_v56 = vpop.xlane.xlu0 %667 }
 0xa8a   :  { %v741_v57 = vsub.f32 %v733_v44, %v739_v9  ;;  %v670_v60 = vsub.f32 %v662_v43, %v668_v56  ;;  %v1269_v56 = vld [vmem:[%s1786_s10 + $0x10] sm:$0xff] }
 0xa8c   :  { %v1351_v58 = vpop.eup %1350  ;;  %v744_v59 = vmul.f32 1.442695, %v741_v57  ;;  %v673_v62 = vmul.f32 1.442695, %v670_v60 }
 0xa8d   :  { %v746_v61 = vsel %vm176_vm8, %v1351_v58, 0.0 }
 0xa8e   :  { %747 = vadd.xlane.f32.xlu1 %v746_v61  ;;  %1352 = vpow2.f32 %v744_v59 }
 0xa8f   :  { %1354 = vpow2.f32 %v673_v62 }
 0xa94   :  { %v1353_v63 = vpop.eup %1352 }
 0xa95   :  { %v749_v0 = vsel %vm176_vm8, %v1353_v63, 0.0  ;;  %v1355_v1 = vpop.eup %1354 }
 0xa96   :  { %750 = vadd.xlane.f32.xlu0 %v749_v0  ;;  %v678_v2 = vsel %vm176_vm8, %v1355_v1, 0.0 }
 0xa9e   :  { %679 = vadd.xlane.f32.xlu0 %v678_v2 }
 0xaa7   :  { %757 = vrot.lane.b32.xlu1 %v636_v49, %s1409_s22 }
 0xae2   :  { %v677_v3 = vpop.xlane.xlu2 %676 }
 0xaea   :  { %v687_v5 = vpop.permute.xlu2 %686 }
 0xaeb   :  { %699 = vmatpush.bf16.msra.mxu1 %v687_v5 }
 0xb01   :  { %v748_v7 = vpop.xlane.xlu1 %747 }
 0xb09   :  { %v751_v6 = vpop.xlane.xlu0 %750 }
 0xb0a   :  { %1356 = vrcp.f32 %v751_v6 }
 0xb0b   :  { %1358 = vrcp.f32 %v748_v7 }
 0xb0c   :  { %1360 = vrcp.f32 %v677_v3 }
 0xb10   :  { %v1357_v11 = vpop.eup %1356 }
 0xb11   :  { %v680_v8 = vpop.xlane.xlu0 %679  ;;  %v1359_v12 = vpop.eup %1358  ;;  %v755_v14 = vmul.f32 %v1357_v11, %v1353_v63  ;;  %v1307_v11 = vld [vmem:[%s1784_s8 + $0x1] ss:$0 sm:$0xff] }
 0xb12   :  { %1362 = vrcp.f32 %v680_v8  ;;  %v1361_v13 = vpop.eup %1360  ;;  %v754_v18 = vmul.f32 %v1359_v12, %v1351_v58 }
 0xb13   :  { %v683_v20 = vmul.f32 %v1361_v13, %v1349_v4 }
 0xb14   :  { %v756_v22 = vpack.c.bf16 %v755_v14, %v754_v18 }
 0xb18   :  { %v1363_v17 = vpop.eup %1362 }
 0xb19   :  { %v758_v19 = vpop.permute.xlu1 %757  ;;  %v684_v21 = vmul.f32 %v1363_v17, %v1355_v1  ;;  %v1308_v17 = vld [vmem:[%s1785_s9 + $0x1] ss:$0 sm:$0xff] }
 0xb1a   :  { %770 = vmatpush.bf16.msrb.mxu2 %v758_v19 }
 0xb1b   :  { %v685_v23 = vpack.c.bf16 %v684_v21, %v683_v20 }
 0xb1d   :  { %1187 = vmatmul.msk.bf16.vlgmr.msrb.gmra.mxu2 %vm176_vm8, %v756_v22  ;;  %1185 = vmatmul.msk.bf16.vlgmr.msra.gmra.mxu1 %vm176_vm8, %v685_v23 }
 0xb9a   :  { %v701_v28 = vpop.f32.mrf.mxu1 }
 0xba0   :  { %v772_v25 = vpop.f32.mrf.mxu2 }
 0xba2   :  { %v703_v31 = vpop.f32.mrf.mxu1 }
 0xba8   :  { %v774_v26 = vpop.f32.mrf.mxu2 }
 0xba9   :  { %v1290_v49 = vpack.i.bf16 %v774_v26, %v772_v25  ;;  %v1273_v25 = vld [vmem:[%s1788_s12 + $0x30] sm:$0xff]  ;;  %v1272_v26 = vld [vmem:[%s1788_s12 + $0x28] sm:$0xff] }
 0xbaa   :  { %992 = vmatpush.bf16.msrb.mxu3 %v1273_v25 }
 0xbab   :  { %1291 = vrot.lane.b32.xlu0 %v1290_v49, %s1410_s24  ;;  %v1271_v49 = vld [vmem:[%s1788_s12 + $0x20] sm:$0xff]  ;;  %s1411_s24 = smov [#allocation2]  }
 0xbac   :  { %s1111_s30 = sshll.u32 %s1411_s24, 4  ;;  %s1112_s30 = int_to_ptr.vmem [resolvable:$true] %s1111_s30 }
 0xbae   :  { %993 = vmatpush.bf16.msrb.mxu3 %v1272_v26 }
 0xbb2   :  { %994 = vmatpush.bf16.msrb.mxu3 %v1271_v49 }
 0xc1d   :  { %v1292_v29 = vpop.permute.xlu0 %1291 }
 0xc1e   :  { %v1294_v50 = vunpack.i.h.bf16 %v1292_v29  ;;  %v1293_v30 = vunpack.i.l.bf16 %v1292_v29 }
 0xc20   :  { %v786_v32 = vsel %vm176_vm8, %v703_v31, %v1294_v50  ;;  %v785_v33 = vsel %vm176_vm8, %v701_v28, %v1293_v30 }
 0xc21   :  { %v787_v34 = vpack.c.bf16 %v786_v32, %v785_v33 }
 0xc23   :  { %1201 = vmatmul.msk.bf16.vlgmr.msrb.gmra.mxu0 %vm65_vm0, %v787_v34 }
 0xca0   :  { %v822_v36 = vpop.f32.mrf.mxu0 }
 0xca1   :  { %v823_v37 = vadd.f32 %v1306_v35, %v822_v36 }
 0xca3   :  { %v827_v38 = vadd.f32 %v823_v37, %v1661_v15 }
 0xca5   :  { %v833_v39 = vsel %vm65_vm0, %v827_v38, 0.0 }
 0xca6   :  { %834 = vadd.xlane.f32.xlu1 %v833_v39 }
 0xca8   :  { %v824_v40 = vpop.f32.mrf.mxu0 }
 0xca9   :  { %v825_v41 = vadd.f32 %v1306_v35, %v824_v40 }
 0xcab   :  { %v828_v42 = vadd.f32 %v825_v41, %v1663_v16  ;;  %v1270_v16 = vld [vmem:[%s1786_s10 + $0x18] sm:$0xff] }
 0xcac   :  { %919 = vmatpush.bf16.msrb.mxu1 %v1270_v16 }
 0xcad   :  { %v836_v43 = vsel %vm65_vm0, %v828_v42, 0.0 }
 0xcae   :  { %837 = vadd.xlane.f32.xlu0 %v836_v43 }
 0xcb0   :  { %920 = vmatpush.bf16.msrb.mxu1 %v1269_v56 }
 0xd19   :  { %v835_v44 = vpop.xlane.xlu1 %834 }
 0xd1a   :  { %v839_v45 = vmul.f32 %v835_v44, %v1515_v10 }
 0xd1c   :  { %v841_v46 = vsub.f32 %v827_v38, %v839_v45 }
 0xd1e   :  { %v843_v47 = vmul.f32 %v841_v46, %v841_v46 }
 0xd20   :  { %v845_v48 = vsel %vm65_vm0, %v843_v47, 0.0 }
 0xd21   :  { %v838_v51 = vpop.xlane.xlu0 %837  ;;  %846 = vadd.xlane.f32.xlu2 %v845_v48 }
 0xd22   :  { %v840_v15 = vmul.f32 %v838_v51, %v1515_v10 }
 0xd24   :  { %v842_v4 = vsub.f32 %v828_v42, %v840_v15  ;;  %v1310_v15 = vld [vmem:[%s1789_s13 + $0x1] ss:$0 sm:$0xff] }
 0xd26   :  { %v844_v52 = vmul.f32 %v842_v4, %v842_v4 }
 0xd28   :  { %v848_v53 = vsel %vm65_vm0, %v844_v52, 0.0 }
 0xd29   :  { %849 = vadd.xlane.f32.xlu1 %v848_v53 }
 0xd94   :  { %v847_v54 = vpop.xlane.xlu2 %846 }
 0xd95   :  { %v851_v55 = vmul.f32 %v847_v54, %v1515_v10 }
 0xd97   :  { %v853_v9 = vadd.f32 1e-12, %v851_v55 }
 0xd99   :  { %1364 = vrsqrt.f32 %v853_v9  ;;  %vm861_vm8 = vweird.f32 %v853_v9 }
 0xd9c   :  { %v850_v57 = vpop.xlane.xlu1 %849 }
 0xd9d   :  { %v852_v58 = vmul.f32 %v850_v57, %v1515_v10 }
 0xd9f   :  { %v1365_v59 = vpop.eup %1364  ;;  %v854_v60 = vadd.f32 1e-12, %v852_v58 }
 0xda0   :  { %v856_v61 = vmul.f32 %v1365_v59, %v853_v9  ;;  %vm862_vm7 = vweird.f32 %v1365_v59 }
 0xda1   :  { %1366 = vrsqrt.f32 %v854_v60  ;;  %vm863_vm9 = vmor %vm861_vm8, %vm862_vm7  ;;  %vm871_vm11 = vweird.f32 %v854_v60 }
 0xda2   :  { %v857_v62 = vmul.f32 %v1365_v59, %v856_v61 }
 0xda4   :  { %v858_v63 = vmul.f32 0.5, %v857_v62 }
 0xda6   :  { %v859_v0 = vsub.f32 1.5, %v858_v63 }
 0xda7   :  { %v1367_v1 = vpop.eup %1366 }
 0xda8   :  { %v860_v2 = vmul.f32 %v1365_v59, %v859_v0  ;;  %v866_v3 = vmul.f32 %v1367_v1, %v854_v60  ;;  %vm872_vm10 = vweird.f32 %v1367_v1 }
 0xda9   :  { %vm873_vm12 = vmor %vm871_vm11, %vm872_vm10 }
 0xdaa   :  { %v867_v5 = vmul.f32 %v1367_v1, %v866_v3  ;;  %v864_v6 = vsel %vm863_vm9, %v1365_v59, %v860_v2 }
 0xdab   :  { %v875_v12 = vmul.f32 %v864_v6, %v841_v46  ;;  %v1276_v6 = vld [vmem:[%s1792_s16 + $0x8] sm:$0xff] }
 0xdac   :  { %v868_v7 = vmul.f32 0.5, %v867_v5  ;;  %1096 = vmatpush.bf16.msra.mxu2 %v1276_v6 }
 0xdad   :  { %v880_v18 = vmul.f32 %v1307_v11, %v875_v12 }
 0xdae   :  { %v869_v8 = vsub.f32 1.5, %v868_v7 }
 0xdaf   :  { %v885_v21 = vadd.f32 %v1308_v17, %v880_v18 }
 0xdb0   :  { %v870_v13 = vmul.f32 %v1367_v1, %v869_v8  ;;  %v1275_v8 = vld [vmem:[%s1792_s16] sm:$0xff] }
 0xdb1   :  { %1097 = vmatpush.bf16.msra.mxu2 %v1275_v8 }
 0xdb2   :  { %v874_v14 = vsel %vm873_vm12, %v1367_v1, %v870_v13 }
 0xdb3   :  { %v876_v19 = vmul.f32 %v874_v14, %v842_v4 }
 0xdb5   :  { %v881_v20 = vmul.f32 %v1307_v11, %v876_v19 }
 0xdb7   :  { %v886_v22 = vadd.f32 %v1308_v17, %v881_v20 }
 0xdb9   :  { %v887_v23 = vpack.c.bf16 %v886_v22, %v885_v21 }
 0xdbb   :  { %1217 = vmatmul.msk.bf16.vlgmr.msrb.gmra.mxu1 %vm65_vm0, %v887_v23 }
 0xe38   :  { %v922_v28 = vpop.f32.mrf.mxu1 }
 0xe39   :  { %v923_v29 = vadd.f32 %v1309_v27, %v922_v28 }
 0xe3b   :  { %v929_v50 = vmul.f32 0.044715, %v923_v29  ;;  %v927_v44 = vmul.f32 0.5, %v923_v29 }
 0xe3d   :  { %v931_v30 = vmul.f32 %v929_v50, %v923_v29 }
 0xe3f   :  { %v933_v31 = vmul.f32 %v931_v30, %v923_v29  ;;  %v1312_v30 = vld [vmem:[%s1791_s15 + $0x1] ss:$0 sm:$0xff] }
 0xe40   :  { %v924_v32 = vpop.f32.mrf.mxu1 }
 0xe41   :  { %v935_v33 = vadd.f32 %v933_v31, %v923_v29  ;;  %v925_v34 = vadd.f32 %v1309_v27, %v924_v32 }
 0xe43   :  { %v930_v35 = vmul.f32 0.044715, %v925_v34  ;;  %v937_v36 = vmul.f32 0.7978846, %v935_v33  ;;  %v928_v45 = vmul.f32 0.5, %v925_v34 }
 0xe45   :  { %v932_v37 = vmul.f32 %v930_v35, %v925_v34  ;;  %1368 = vtanh.f32 %v937_v36 }
 0xe47   :  { %v934_v38 = vmul.f32 %v932_v37, %v925_v34 }
 0xe49   :  { %v936_v39 = vadd.f32 %v934_v38, %v925_v34  ;;  %v1313_v38 = vld [vmem:[%s1793_s17] ss:$0 sm:$0xff] }
 0xe4b   :  { %v938_v40 = vmul.f32 0.7978846, %v936_v39  ;;  %v1369_v41 = vpop.eup %1368 }
 0xe4c   :  { %v941_v42 = vadd.f32 1.0, %v1369_v41 }
 0xe4d   :  { %1370 = vtanh.f32 %v938_v40 }
 0xe4e   :  { %v943_v47 = vmul.f32 %v941_v42, %v927_v44 }
 0xe53   :  { %v1371_v43 = vpop.eup %1370 }
 0xe54   :  { %v942_v46 = vadd.f32 1.0, %v1371_v43 }
 0xe56   :  { %v944_v48 = vmul.f32 %v942_v46, %v928_v45 }
 0xe58   :  { %v945_v51 = vpack.c.bf16 %v944_v48, %v943_v47 }
 0xe5a   :  { %1243 = vmatmul.msk.bf16.vlgmr.msrb.gmra.mxu3 %vm514_vm15, %v945_v51 }
 0xedd   :  { %v996_v4 = vpop.f32.mrf.mxu3 }
 0xede   :  { %v997_v52 = vadd.f32 %v1310_v15, %v996_v4 }
 0xee0   :  { %v1001_v53 = vadd.f32 %v997_v52, %v885_v21 }
 0xee2   :  { %v1007_v16 = vsel %vm65_vm0, %v1001_v53, 0.0 }
 0xee3   :  { %1008 = vadd.xlane.f32.xlu0 %v1007_v16 }
 0xee5   :  { %v998_v54 = vpop.f32.mrf.mxu3 }
 0xee6   :  { %v999_v55 = vadd.f32 %v1310_v15, %v998_v54 }
 0xee8   :  { %v1002_v9 = vadd.f32 %v999_v55, %v886_v22 }
 0xeea   :  { %v1010_v56 = vsel %vm65_vm0, %v1002_v9, 0.0 }
 0xeeb   :  { %1011 = vadd.xlane.f32.xlu1 %v1010_v56 }
 0xf56   :  { %v1009_v57 = vpop.xlane.xlu0 %1008 }
 0xf57   :  { %v1013_v58 = vmul.f32 %v1009_v57, %v1515_v10 }
 0xf59   :  { %v1015_v59 = vsub.f32 %v1001_v53, %v1013_v58 }
 0xf5b   :  { %v1017_v60 = vmul.f32 %v1015_v59, %v1015_v59 }
 0xf5d   :  { %v1019_v61 = vsel %vm65_vm0, %v1017_v60, 0.0 }
 0xf5e   :  { %v1012_v62 = vpop.xlane.xlu1 %1011  ;;  %1020 = vadd.xlane.f32.xlu1 %v1019_v61 }
 0xf5f   :  { %v1014_v63 = vmul.f32 %v1012_v62, %v1515_v10 }
 0xf61   :  { %v1016_v0 = vsub.f32 %v1002_v9, %v1014_v63 }
 0xf63   :  { %v1018_v1 = vmul.f32 %v1016_v0, %v1016_v0 }
 0xf65   :  { %v1022_v2 = vsel %vm65_vm0, %v1018_v1, 0.0 }
 0xf66   :  { %1023 = vadd.xlane.f32.xlu2 %v1022_v2 }
 0xfd1   :  { %v1021_v3 = vpop.xlane.xlu1 %1020 }
 0xfd2   :  { %v1025_v5 = vmul.f32 %v1021_v3, %v1515_v10 }
 0xfd4   :  { %v1027_v7 = vadd.f32 1e-12, %v1025_v5 }
 0xfd6   :  { %1372 = vrsqrt.f32 %v1027_v7  ;;  %vm1035_vm14 = vweird.f32 %v1027_v7 }
 0xfd9   :  { %v1024_v11 = vpop.xlane.xlu2 %1023 }
 0xfda   :  { %v1026_v12 = vmul.f32 %v1024_v11, %v1515_v10  ;;  %v1311_v10 = vld [vmem:[%s1790_s14 + $0x1] ss:$0 sm:$0xff] }
 0xfdc   :  { %v1373_v13 = vpop.eup %1372  ;;  %v1028_v14 = vadd.f32 1e-12, %v1026_v12 }
 0xfdd   :  { %v1030_v17 = vmul.f32 %v1373_v13, %v1027_v7  ;;  %vm1036_vm13 = vweird.f32 %v1373_v13 }
 0xfde   :  { %1374 = vrsqrt.f32 %v1028_v14  ;;  %vm1037_vm15 = vmor %vm1035_vm14, %vm1036_vm13  ;;  %vm1045_vm2 = vweird.f32 %v1028_v14 }
 0xfdf   :  { %v1031_v18 = vmul.f32 %v1373_v13, %v1030_v17 }
 0xfe1   :  { %v1032_v19 = vmul.f32 0.5, %v1031_v18 }
 0xfe3   :  { %v1033_v20 = vsub.f32 1.5, %v1032_v19 }
 0xfe4   :  { %v1375_v21 = vpop.eup %1374 }
 0xfe5   :  { %v1040_v22 = vmul.f32 %v1375_v21, %v1028_v14  ;;  %v1034_v23 = vmul.f32 %v1373_v13, %v1033_v20  ;;  %vm1046_vm1 = vweird.f32 %v1375_v21 }
 0xfe6   :  { %vm1047_vm3 = vmor %vm1045_vm2, %vm1046_vm1 }
 0xfe7   :  { %v1041_v24 = vmul.f32 %v1375_v21, %v1040_v22  ;;  %v1038_v26 = vsel %vm1037_vm15, %v1373_v13, %v1034_v23 }
 0xfe8   :  { %v1049_v28 = vmul.f32 %v1038_v26, %v1015_v59 }
 0xfe9   :  { %v1042_v25 = vmul.f32 0.5, %v1041_v24 }
 0xfea   :  { %v1054_v31 = vmul.f32 %v1311_v10, %v1049_v28 }
 0xfeb   :  { %v1043_v49 = vsub.f32 1.5, %v1042_v25 }
 0xfec   :  { %v1059_v34 = vadd.f32 %v1312_v30, %v1054_v31 }
 0xfed   :  { %v1044_v27 = vmul.f32 %v1375_v21, %v1043_v49 }
 0xfef   :  { %v1048_v29 = vsel %vm1047_vm3, %v1375_v21, %v1044_v27 }
 0xff0   :  { %v1050_v50 = vmul.f32 %v1048_v29, %v1016_v0 }
 0xff2   :  { %v1055_v32 = vmul.f32 %v1311_v10, %v1050_v50 }
 0xff4   :  { %v1060_v33 = vadd.f32 %v1312_v30, %v1055_v32 }
 0xff6   :  { %v1062_v35 = vrot.slane %v1060_v33, 7 }
 0xff8   :  { %v1065_v36 = vsel %vm1064_vm4, %v1059_v34, %v1062_v35 }
 0xff9   :  { %v1066_v37 = vpack.c.bf16 %v1065_v36, %v1065_v36 }
 0xffb   :  { %1254 = vmatmul.msk.bf16.vlgmr.msra.gmra.mxu2 %vm65_vm0, %v1066_v37 }
0x107e   :  { %v1099_v39 = vpop.f32.mrf.mxu2 }
0x107f   :  { %v1100_v40 = vadd.f32 %v1313_v38, %v1099_v39 }
0x1081   :  { %1376 = vtanh.f32 %v1100_v40 }
0x1086   :  { %v1101_v41 = vpop.f32.mrf.mxu2 }
0x1087   :  { %v1377_v42 = vpop.eup %1376 }
0x1088   :  { %1105 = vst.msk [vmem:[#allocation2] sm:$0x3] %vm1104_vm5, %v1377_v42 }
0x1089   :  { %1116 = dma.vmem_to_hbm [thread:$0]  %s1112_s30, 32, %s1114_s0, [#allocation3]  }
0x108a   :  { %1402 = dma.done.wait [#allocation3], 32  }
0x108b   :  { %1403 = vsyncadd [#allocation3], 4294967264 }
0x108c   :  { %1121 = vsyncpa [#allocation3], 1 }

</bundles_post_ra>
